<compile_context>
chip_gen: v5e
topology: v5e:2x2
jax: 0.10.0
libtpu: 0.0.40
codegen_flags: <defaults>
</compile_context>

<pallas_src>
import jax
import jax.numpy as jnp
from jax.experimental import pallas as pl
from jax.experimental.pallas import tpu as pltpu

_EPS = 1e-5  # torch.nn.LayerNorm default eps


def _round_up(n, m):
    return ((n + m - 1) // m) * m


def _pick_batch_tile(B):
    # Prefer a tile that fills the MXU M dimension (>=256) AND leaves >=2 grid
    # steps for pipelining / the v7x megacore split; otherwise the largest
    # multiple-of-16 divisor (capped at 512 so the per-tile slab set stays far
    # under v7x's 64 MiB VMEM); finally fall back to a single full-batch tile.
    for tb in (512, 256):
        if B % tb == 0 and B // tb >= 2:
            return tb
    for tb in (512, 256, 128, 64, 32, 16):
        if B % tb == 0:
            return tb
    return B


# ------------------------------ fused kernel --------------------------------
def _vsn_kernel(x_ref, ctx_ref,
                wf1_ref, bf1_ref, wfc_ref, wf2_ref, bf2_ref,
                wfg_ref, bfg_ref, wfsk_ref, lnwf_ref, lnbf_ref,
                w1sk_ref, b1sk_ref, w2_ref, b2_ref, wg_ref, bg_ref,
                lnw_ref, lnb_ref,
                mavg_ref, eexp_ref, splace_ref, wplace_ref,
                out_ref):
    f32 = jnp.float32
    VH = mavg_ref.shape[0]          # num_inputs * hidden_dim (<= 256 lanes)

    x = x_ref[...]                  # (TB, V*D), f32 or bf16 fed straight to MXU
    ctx = ctx_ref[...]              # (TB, C)

    def elu(v):
        return jnp.where(v > 0, v, jnp.exp(v) - 1.0)

    def sigmoid(v):
        return 1.0 / (1.0 + jnp.exp(-v))

    def mm(a, w_ref):
        # cast LHS to the weight dtype (no-op in f32 mode, bf16 MXU otherwise);
        # always accumulate in f32.
        return jnp.dot(a.astype(w_ref.dtype), w_ref[...],
                       preferred_element_type=f32)

    # ------------- flattened GRN -> variable-selection weights --------------
    # Spec order: skip ; fc1 (+ctx) ; fc2 ; ELU ; [dropout] ; sigmoid gate ;
    #             * ; + residual ; LayerNorm.
    # TODO(synk): training-mode dropout omitted; this is the eval forward.
    res_f = mm(x, wfsk_ref)                                         # (TB, V)
    h = mm(x, wf1_ref) + bf1_ref[...]
    h = h + mm(ctx, wfc_ref)
    a = elu(mm(h, wf2_ref) + bf2_ref[...])                          # (TB, V)
    g = sigmoid(mm(a, wfg_ref) + bfg_ref[...])
    z = a * g + res_f
    mu = jnp.mean(z, axis=-1, keepdims=True)
    var = jnp.mean(jnp.square(z - mu), axis=-1, keepdims=True)
    sw = (z - mu) * jax.lax.rsqrt(var + _EPS) * lnwf_ref[...] + lnbf_ref[...]

    m = jnp.max(sw, axis=-1, keepdims=True)                         # softmax over V
    e = jnp.exp(sw - m)
    w = e / jnp.sum(e, axis=-1, keepdims=True)                      # (TB, V)

    # ------ all V single-variable GRNs via block-diagonal matmuls -----------
    # fc1 and skip share the same LHS x, fused into one 256-wide MXU push.
    y = mm(x, w1sk_ref) + b1sk_ref[...]                             # (TB, 2*VH)
    h1 = y[:, :VH]                                                  # fc1 (+bias)
    res = y[:, VH:]                                                 # residual/skip
    a1 = elu(mm(h1, w2_ref) + b2_ref[...])                          # (TB, VH)
    g1 = sigmoid(mm(a1, wg_ref) + bg_ref[...])
    z1 = a1 * g1 + res

    # Per-variable LayerNorm with the hoisted block-averaging matrix.
    mu1 = mm(z1, mavg_ref)                                          # per-block mean
    d = z1 - mu1
    var1 = mm(d * d, mavg_ref)                                      # per-block var
    ln = d * jax.lax.rsqrt(var1 + _EPS) * lnw_ref[...] + lnb_ref[...]

    # ------ weighted sum over variables + lane-dense packed store -----------
    #   slab[:, :H]     = sum_v w[:, v] * ln[:, v*H:(v+1)*H]
    #   slab[:, H:H+V]  = w (softmax weights)
    w_full = mm(w, eexp_ref)                                        # (TB, VH)
    slab = mm(ln * w_full, splace_ref) + mm(w, wplace_ref)          # (TB, PAD)
    out_ref[...] = slab.astype(out_ref.dtype)


# ------------------------------- wrapper ------------------------------------
def vsn_forward(flattened_embedding, context, fused_params, *,
                num_inputs, input_dim, hidden_dim, batch_tile=None):
    """Pallas VSN forward. Returns (outputs (B,H), sparse_weights (B,V,1))."""
    B, VD = flattened_embedding.shape
    V, D, H = num_inputs, input_dim, hidden_dim
    assert VD == V * D
    PAD = fused_params[-1].shape[1]          # lane-dense output slab width

    TB = batch_tile if batch_tile is not None else _pick_batch_tile(B)
    assert B % TB == 0 and (TB == B or TB % 8 == 0)

    def rep(arr):   # replicated parameter (constant index_map => fetched once)
        return pl.BlockSpec(arr.shape, lambda b: (0, 0))

    def bat(arr):   # batch-tiled activation
        return pl.BlockSpec((TB, arr.shape[1]), lambda b: (b, 0))

    in_specs = ([bat(flattened_embedding), bat(context)]
                + [rep(a) for a in fused_params])
    out_specs = pl.BlockSpec((TB, PAD), lambda b: (b, 0))
    out_shape = jax.ShapeDtypeStruct((B, PAD), jnp.float32)

    slab = pl.pallas_call(
        _vsn_kernel,
        out_shape=out_shape,
        grid=(B // TB,),
        in_specs=in_specs,
        out_specs=out_specs,
        compiler_params=pltpu.CompilerParams(
            dimension_semantics=("parallel",),
            vmem_limit_bytes=32 * 1024 * 1024),
    )(flattened_embedding, context, *fused_params)

    outputs = slab[:, :H]
    weights = slab[:, H:H + V]
    return outputs, weights[:, :, None]


# ------------------------- parameter construction ---------------------------
def init_vsn_params(key, num_inputs, input_dim, hidden_dim, context_dim):
    V, D, H, C = num_inputs, input_dim, hidden_dim, context_dim
    VD = V * D
    ks = list(jax.random.split(key, 24))
    s = 0.1
    nrm = lambda k, shp: s * jax.random.normal(k, shp, jnp.float32)
    p = {
        # flattened GRN:  (V*D) -> H -> V, with context projection (C -> H)
        "wf1": nrm(ks[0], (VD, H)), "bf1": nrm(ks[1], (1, H)),
        "wfc": nrm(ks[2], (C, H)),
        "wf2": nrm(ks[3], (H, V)), "bf2": nrm(ks[4], (1, V)),
        "wfg": nrm(ks[5], (V, V)), "bfg": nrm(ks[6], (1, V)),
        "wfsk": nrm(ks[7], (VD, V)),
        "lnwf": 1.0 + nrm(ks[8], (1, V)), "lnbf": nrm(ks[9], (1, V)),
        # V single-variable GRNs: D -> H -> H, no context
        "w1": nrm(ks[10], (V, D, H)), "b1": nrm(ks[11], (V, H)),
        "w2": nrm(ks[12], (V, H, H)), "b2": nrm(ks[13], (V, H)),
        "wg": nrm(ks[14], (V, H, H)), "bg": nrm(ks[15], (V, H)),
        "lnw": 1.0 + nrm(ks[16], (V, H)), "lnb": nrm(ks[17], (V, H)),
    }
    if D != H:  # project_residual path of the single-variable GRNs
        p["wsk"] = nrm(ks[18], (V, D, H))
    return p


def fuse_vsn_params(p, num_inputs, input_dim, hidden_dim, dtype=jnp.float32):
    """Done once at model init (hoisted out of the per-call hot path).

    `dtype` controls the matmul-weight precision (f32 or bf16 for the MXU);
    biases, LayerNorm params, softmax statistics and masks stay f32.
    """
    V, D, H = num_inputs, input_dim, hidden_dim
    VD, VH = V * D, V * H
    PAD = _round_up(H + V, 128)
    # Scaling guard: beyond ~2 MXU tiles the block-diagonal weights are mostly
    # zeros -> switch to a per-variable grid axis instead of widening this path.
    assert VH <= 256 and VD <= 256, "block-diag VSN fusion intended for V*H<=256"

    def block_diag(w):            # (V, a, b) -> (V*a, V*b)
        _, a, b = w.shape
        out = jnp.zeros((V * a, V * b), jnp.float32)
        for i in range(V):
            out = out.at[i * a:(i + 1) * a, i * b:(i + 1) * b].set(w[i])
        return out

    flat = lambda a: a.reshape(1, -1).astype(jnp.float32)
    cast = lambda a: a.astype(dtype)

    if D == H:   # identity skip (NullTransform) == block-diagonal identity
        wsk = jnp.broadcast_to(jnp.eye(D, dtype=jnp.float32), (V, D, H))
    else:
        wsk = p["wsk"]

    # fc1 and skip share the LHS x -> concatenate along the output dim (256 wide)
    w1sk = jnp.concatenate([block_diag(p["w1"]), block_diag(wsk)], axis=1)
    b1sk = jnp.concatenate([flat(p["b1"]), jnp.zeros((1, VH), jnp.float32)], axis=1)

    # Constant masks, built once here instead of per grid step in the kernel.
    r = jnp.arange(VH)[:, None] // H
    c = jnp.arange(VH)[None, :] // H
    m_avg = jnp.where(r == c, 1.0 / H, 0.0).astype(jnp.float32)        # (VH, VH)

    ve = jnp.arange(V)[:, None]
    je = jnp.arange(VH)[None, :] // H
    e_exp = (ve == je).astype(jnp.float32)                             # (V, VH)

    rs = jnp.arange(VH)[:, None] % H
    cs = jnp.arange(PAD)[None, :]
    s_place = (rs == cs).astype(jnp.float32)                           # (VH, PAD)

    wv = jnp.arange(V)[:, None]
    wc = jnp.arange(PAD)[None, :]
    w_place = (wc == (wv + H)).astype(jnp.float32)                     # (V, PAD)

    return (cast(p["wf1"]), flat(p["bf1"]), cast(p["wfc"]),
            cast(p["wf2"]), flat(p["bf2"]),
            cast(p["wfg"]), flat(p["bfg"]), cast(p["wfsk"]),
            flat(p["lnwf"]), flat(p["lnbf"]),
            cast(w1sk), b1sk,
            cast(block_diag(p["w2"])), flat(p["b2"]),
            cast(block_diag(p["wg"])), flat(p["bg"]),
            flat(p["lnw"]), flat(p["lnb"]),
            m_avg, e_exp, s_place, w_place)


# --------------------------- plain-JAX reference ----------------------------
def vsn_reference(x, ctx, p, num_inputs, input_dim, hidden_dim):
    V, D, H = num_inputs, input_dim, hidden_dim

    def grn(h_in, w1, b1, w2, b2, wg, bg, lnw, lnb, wsk=None, c=None, wc=None):
        residual = h_in if wsk is None else h_in @ wsk
        h = h_in @ w1 + b1
        if c is not None and wc is not None:
            h = h + c @ wc
        y = h @ w2 + b2
        a = jax.nn.elu(y)
        g = jax.nn.sigmoid(a @ wg + bg)
        z = a * g + residual
        mu = z.mean(-1, keepdims=True)
        var = ((z - mu) ** 2).mean(-1, keepdims=True)
        return (z - mu) / jnp.sqrt(var + _EPS) * lnw + lnb

    sw = grn(x, p["wf1"], p["bf1"], p["wf2"], p["bf2"], p["wfg"], p["bfg"],
             p["lnwf"], p["lnbf"], wsk=p["wfsk"], c=ctx, wc=p["wfc"])
    w = jax.nn.softmax(sw, axis=1)                        # (B, V)
    outs = []
    for i in range(V):
        xi = x[:, i * D:(i + 1) * D]
        wsk_i = None if D == H else p["wsk"][i]
        outs.append(grn(xi, p["w1"][i], p["b1"][i], p["w2"][i], p["b2"][i],
                        p["wg"][i], p["bg"][i], p["lnw"][i], p["lnb"][i],
                        wsk=wsk_i))
    proc = jnp.stack(outs, axis=-1)                       # (B, H, V)
    out = (proc * w[:, None, :]).sum(-1)                  # (B, H)
    return out, w[:, :, None]


if __name__ == "__main__":
    # 4 variables of state_size 32 -> flattened 128 lanes; context width 16.
    batch, num_inputs, input_dim, hidden_dim, context_dim = 64, 4, 32, 32, 16
    key = jax.random.PRNGKey(0)
    kx, kc, kp = jax.random.split(key, 3)
    x = jax.random.normal(kx, (batch, num_inputs * input_dim), jnp.float32)
    ctx = jax.random.normal(kc, (batch, context_dim), jnp.float32)

    params = init_vsn_params(kp, num_inputs, input_dim, hidden_dim, context_dim)
    ref_out, ref_sw = vsn_reference(x, ctx, params,
                                    num_inputs, input_dim, hidden_dim)

    # --- f32 path, multi-step batch grid (4 tiles of 16 rows) ---------------
    fused = fuse_vsn_params(params, num_inputs, input_dim, hidden_dim)
    out, sw = vsn_forward(x, ctx, fused, num_inputs=num_inputs,
                          input_dim=input_dim, hidden_dim=hidden_dim,
                          batch_tile=16)
    out, sw = jax.block_until_ready((out, sw))

    ok = (out.shape == (batch, hidden_dim)
          and sw.shape == (batch, num_inputs, 1)
          and bool(jnp.allclose(out, ref_out, atol=1e-4, rtol=1e-4))
          and bool(jnp.allclose(sw, ref_sw, atol=1e-4, rtol=1e-4)))

    # --- bf16 matmul-input path (half HBM traffic, 2x MXU) — coarse parity ---
    fused_bf = fuse_vsn_params(params, num_inputs, input_dim, hidden_dim,
                               dtype=jnp.bfloat16)
    out_bf, sw_bf = vsn_forward(x.astype(jnp.bfloat16), ctx.astype(jnp.bfloat16),
                                fused_bf, num_inputs=num_inputs,
                                input_dim=input_dim, hidden_dim=hidden_dim)
    out_bf, sw_bf = jax.block_until_ready((out_bf, sw_bf))
    err_out = float(jnp.max(jnp.abs(out_bf - ref_out)))
    err_sw = float(jnp.max(jnp.abs(sw_bf - ref_sw)))
    ok = ok and bool(jnp.all(jnp.isfinite(out_bf))) and err_out < 1e-1 and err_sw < 5e-2

    if ok:
        print("KERNEL_OK")
    else:
        raise SystemExit("mismatch vs reference")
</pallas_src>

<mosaic_0001>
module attributes {stable_mosaic.version = 11 : i64} {
  func.func @_vsn_kernel(%arg0: i32, %arg1: memref<16x128xf32, #tpu.memory_space<vmem>>, %arg2: memref<16x16xf32, #tpu.memory_space<vmem>>, %arg3: memref<128x32xf32, #tpu.memory_space<vmem>>, %arg4: memref<1x32xf32, #tpu.memory_space<vmem>>, %arg5: memref<16x32xf32, #tpu.memory_space<vmem>>, %arg6: memref<32x4xf32, #tpu.memory_space<vmem>>, %arg7: memref<1x4xf32, #tpu.memory_space<vmem>>, %arg8: memref<4x4xf32, #tpu.memory_space<vmem>>, %arg9: memref<1x4xf32, #tpu.memory_space<vmem>>, %arg10: memref<128x4xf32, #tpu.memory_space<vmem>>, %arg11: memref<1x4xf32, #tpu.memory_space<vmem>>, %arg12: memref<1x4xf32, #tpu.memory_space<vmem>>, %arg13: memref<128x256xf32, #tpu.memory_space<vmem>>, %arg14: memref<1x256xf32, #tpu.memory_space<vmem>>, %arg15: memref<128x128xf32, #tpu.memory_space<vmem>>, %arg16: memref<1x128xf32, #tpu.memory_space<vmem>>, %arg17: memref<128x128xf32, #tpu.memory_space<vmem>>, %arg18: memref<1x128xf32, #tpu.memory_space<vmem>>, %arg19: memref<1x128xf32, #tpu.memory_space<vmem>>, %arg20: memref<1x128xf32, #tpu.memory_space<vmem>>, %arg21: memref<128x128xf32, #tpu.memory_space<vmem>>, %arg22: memref<4x128xf32, #tpu.memory_space<vmem>>, %arg23: memref<128x128xf32, #tpu.memory_space<vmem>>, %arg24: memref<4x128xf32, #tpu.memory_space<vmem>>, %arg25: memref<16x128xf32, #tpu.memory_space<vmem>>) attributes {dimension_semantics = [#tpu.dimension_semantics<parallel>], iteration_bounds = array<i64: 4>, scalar_prefetch = 0 : i64, scratch_operands = 0 : i64, tpu.core_type = #tpu.core_type<tc>, window_params = [{transform_indices = @transform_0, window_bounds = array<i64: 16, 128>}, {transform_indices = @transform_1, window_bounds = array<i64: 16, 16>}, {pipeline_mode = #tpu.pipeline_mode<synchronous>, transform_indices = @transform_2, window_bounds = array<i64: 128, 32>}, {pipeline_mode = #tpu.pipeline_mode<synchronous>, transform_indices = @transform_3, window_bounds = array<i64: 1, 32>}, {pipeline_mode = #tpu.pipeline_mode<synchronous>, transform_indices = @transform_4, window_bounds = array<i64: 16, 32>}, {pipeline_mode = #tpu.pipeline_mode<synchronous>, transform_indices = @transform_5, window_bounds = array<i64: 32, 4>}, {pipeline_mode = #tpu.pipeline_mode<synchronous>, transform_indices = @transform_6, window_bounds = array<i64: 1, 4>}, {pipeline_mode = #tpu.pipeline_mode<synchronous>, transform_indices = @transform_7, window_bounds = array<i64: 4, 4>}, {pipeline_mode = #tpu.pipeline_mode<synchronous>, transform_indices = @transform_8, window_bounds = array<i64: 1, 4>}, {pipeline_mode = #tpu.pipeline_mode<synchronous>, transform_indices = @transform_9, window_bounds = array<i64: 128, 4>}, {pipeline_mode = #tpu.pipeline_mode<synchronous>, transform_indices = @transform_10, window_bounds = array<i64: 1, 4>}, {pipeline_mode = #tpu.pipeline_mode<synchronous>, transform_indices = @transform_11, window_bounds = array<i64: 1, 4>}, {pipeline_mode = #tpu.pipeline_mode<synchronous>, transform_indices = @transform_12, window_bounds = array<i64: 128, 256>}, {pipeline_mode = #tpu.pipeline_mode<synchronous>, transform_indices = @transform_13, window_bounds = array<i64: 1, 256>}, {pipeline_mode = #tpu.pipeline_mode<synchronous>, transform_indices = @transform_14, window_bounds = array<i64: 128, 128>}, {pipeline_mode = #tpu.pipeline_mode<synchronous>, transform_indices = @transform_15, window_bounds = array<i64: 1, 128>}, {pipeline_mode = #tpu.pipeline_mode<synchronous>, transform_indices = @transform_16, window_bounds = array<i64: 128, 128>}, {pipeline_mode = #tpu.pipeline_mode<synchronous>, transform_indices = @transform_17, window_bounds = array<i64: 1, 128>}, {pipeline_mode = #tpu.pipeline_mode<synchronous>, transform_indices = @transform_18, window_bounds = array<i64: 1, 128>}, {pipeline_mode = #tpu.pipeline_mode<synchronous>, transform_indices = @transform_19, window_bounds = array<i64: 1, 128>}, {pipeline_mode = #tpu.pipeline_mode<synchronous>, transform_indices = @transform_20, window_bounds = array<i64: 128, 128>}, {pipeline_mode = #tpu.pipeline_mode<synchronous>, transform_indices = @transform_21, window_bounds = array<i64: 4, 128>}, {pipeline_mode = #tpu.pipeline_mode<synchronous>, transform_indices = @transform_22, window_bounds = array<i64: 128, 128>}, {pipeline_mode = #tpu.pipeline_mode<synchronous>, transform_indices = @transform_23, window_bounds = array<i64: 4, 128>}, {transform_indices = @transform_24, window_bounds = array<i64: 16, 128>}]} {
    %c0 = arith.constant 0 : index
    %c0_0 = arith.constant 0 : index
    %0 = vector.load %arg1[%c0, %c0_0] : memref<16x128xf32, #tpu.memory_space<vmem>>, vector<16x128xf32>
    %c0_1 = arith.constant 0 : index
    %c0_2 = arith.constant 0 : index
    %1 = vector.load %arg2[%c0_1, %c0_2] : memref<16x16xf32, #tpu.memory_space<vmem>>, vector<16x16xf32>
    %c0_3 = arith.constant 0 : index
    %c0_4 = arith.constant 0 : index
    %2 = vector.load %arg10[%c0_3, %c0_4] : memref<128x4xf32, #tpu.memory_space<vmem>>, vector<128x4xf32>
    %cst = arith.constant dense<0.000000e+00> : vector<16x4xf32>
    %3 = tpu.matmul %0, %2, %cst {dimension_numbers = #tpu.dot_dimension_numbers<[1], [0], [0], [1], [0, 0, 1, 1], [], []>} : vector<16x128xf32>, vector<128x4xf32>, vector<16x4xf32> -> vector<16x4xf32>
    %c0_5 = arith.constant 0 : index
    %c0_6 = arith.constant 0 : index
    %4 = vector.load %arg3[%c0_5, %c0_6] : memref<128x32xf32, #tpu.memory_space<vmem>>, vector<128x32xf32>
    %cst_7 = arith.constant dense<0.000000e+00> : vector<16x32xf32>
    %5 = tpu.matmul %0, %4, %cst_7 {dimension_numbers = #tpu.dot_dimension_numbers<[1], [0], [0], [1], [0, 0, 1, 1], [], []>} : vector<16x128xf32>, vector<128x32xf32>, vector<16x32xf32> -> vector<16x32xf32>
    %c0_8 = arith.constant 0 : index
    %c0_9 = arith.constant 0 : index
    %6 = vector.load %arg4[%c0_8, %c0_9] : memref<1x32xf32, #tpu.memory_space<vmem>>, vector<1x32xf32>
    %7 = vector.broadcast %6 : vector<1x32xf32> to vector<16x32xf32>
    %8 = arith.addf %5, %7 : vector<16x32xf32>
    %c0_10 = arith.constant 0 : index
    %c0_11 = arith.constant 0 : index
    %9 = vector.load %arg5[%c0_10, %c0_11] : memref<16x32xf32, #tpu.memory_space<vmem>>, vector<16x32xf32>
    %cst_12 = arith.constant dense<0.000000e+00> : vector<16x32xf32>
    %10 = tpu.matmul %1, %9, %cst_12 {dimension_numbers = #tpu.dot_dimension_numbers<[1], [0], [0], [1], [0, 0, 1, 1], [], []>} : vector<16x16xf32>, vector<16x32xf32>, vector<16x32xf32> -> vector<16x32xf32>
    %11 = arith.addf %8, %10 : vector<16x32xf32>
    %c0_13 = arith.constant 0 : index
    %c0_14 = arith.constant 0 : index
    %12 = vector.load %arg6[%c0_13, %c0_14] : memref<32x4xf32, #tpu.memory_space<vmem>>, vector<32x4xf32>
    %cst_15 = arith.constant dense<0.000000e+00> : vector<16x4xf32>
    %13 = tpu.matmul %11, %12, %cst_15 {dimension_numbers = #tpu.dot_dimension_numbers<[1], [0], [0], [1], [0, 0, 1, 1], [], []>} : vector<16x32xf32>, vector<32x4xf32>, vector<16x4xf32> -> vector<16x4xf32>
    %c0_16 = arith.constant 0 : index
    %c0_17 = arith.constant 0 : index
    %14 = vector.load %arg7[%c0_16, %c0_17] : memref<1x4xf32, #tpu.memory_space<vmem>>, vector<1x4xf32>
    %15 = vector.broadcast %14 : vector<1x4xf32> to vector<16x4xf32>
    %16 = arith.addf %13, %15 : vector<16x4xf32>
    %cst_18 = arith.constant 0.000000e+00 : f32
    %17 = vector.broadcast %cst_18 : f32 to vector<16x4xf32>
    %18 = arith.cmpf ogt, %16, %17 : vector<16x4xf32>
    %19 = math.exp %16 : vector<16x4xf32>
    %cst_19 = arith.constant 1.000000e+00 : f32
    %20 = vector.broadcast %cst_19 : f32 to vector<16x4xf32>
    %21 = arith.subf %19, %20 : vector<16x4xf32>
    %22 = arith.select %18, %16, %21 : vector<16x4xi1>, vector<16x4xf32>
    %c0_20 = arith.constant 0 : index
    %c0_21 = arith.constant 0 : index
    %23 = vector.load %arg8[%c0_20, %c0_21] : memref<4x4xf32, #tpu.memory_space<vmem>>, vector<4x4xf32>
    %cst_22 = arith.constant dense<0.000000e+00> : vector<16x4xf32>
    %24 = tpu.matmul %22, %23, %cst_22 {dimension_numbers = #tpu.dot_dimension_numbers<[1], [0], [0], [1], [0, 0, 1, 1], [], []>} : vector<16x4xf32>, vector<4x4xf32>, vector<16x4xf32> -> vector<16x4xf32>
    %c0_23 = arith.constant 0 : index
    %c0_24 = arith.constant 0 : index
    %25 = vector.load %arg9[%c0_23, %c0_24] : memref<1x4xf32, #tpu.memory_space<vmem>>, vector<1x4xf32>
    %26 = vector.broadcast %25 : vector<1x4xf32> to vector<16x4xf32>
    %27 = arith.addf %24, %26 : vector<16x4xf32>
    %cst_25 = arith.constant 0.000000e+00 : f32
    %28 = vector.broadcast %cst_25 : f32 to vector<16x4xf32>
    %29 = arith.subf %28, %27 : vector<16x4xf32>
    %30 = math.exp %29 : vector<16x4xf32>
    %cst_26 = arith.constant 1.000000e+00 : f32
    %31 = vector.broadcast %cst_26 : f32 to vector<16x4xf32>
    %32 = arith.addf %31, %30 : vector<16x4xf32>
    %cst_27 = arith.constant 1.000000e+00 : f32
    %33 = vector.broadcast %cst_27 : f32 to vector<16x4xf32>
    %34 = arith.divf %33, %32 : vector<16x4xf32>
    %35 = arith.mulf %22, %34 : vector<16x4xf32>
    %36 = arith.addf %35, %3 : vector<16x4xf32>
    %cst_28 = arith.constant dense<0.000000e+00> : vector<16xf32>
    %37 = vector.multi_reduction <add>, %36, %cst_28 [1] : vector<16x4xf32> to vector<16xf32>
    %38 = vector.shape_cast %37 : vector<16xf32> to vector<16x1xf32>
    %cst_29 = arith.constant 4.000000e+00 : f32
    %39 = vector.broadcast %cst_29 : f32 to vector<16x1xf32>
    %40 = arith.divf %38, %39 : vector<16x1xf32>
    %41 = vector.broadcast %40 : vector<16x1xf32> to vector<16x4xf32>
    %42 = arith.subf %36, %41 : vector<16x4xf32>
    %43 = arith.mulf %42, %42 : vector<16x4xf32>
    %cst_30 = arith.constant dense<0.000000e+00> : vector<16xf32>
    %44 = vector.multi_reduction <add>, %43, %cst_30 [1] : vector<16x4xf32> to vector<16xf32>
    %45 = vector.shape_cast %44 : vector<16xf32> to vector<16x1xf32>
    %cst_31 = arith.constant 4.000000e+00 : f32
    %46 = vector.broadcast %cst_31 : f32 to vector<16x1xf32>
    %47 = arith.divf %45, %46 : vector<16x1xf32>
    %48 = vector.broadcast %40 : vector<16x1xf32> to vector<16x4xf32>
    %49 = arith.subf %36, %48 : vector<16x4xf32>
    %cst_32 = arith.constant 9.99999974E-6 : f32
    %50 = vector.broadcast %cst_32 : f32 to vector<16x1xf32>
    %51 = arith.addf %47, %50 : vector<16x1xf32>
    %52 = math.rsqrt %51 : vector<16x1xf32>
    %53 = vector.broadcast %52 : vector<16x1xf32> to vector<16x4xf32>
    %54 = arith.mulf %49, %53 : vector<16x4xf32>
    %c0_33 = arith.constant 0 : index
    %c0_34 = arith.constant 0 : index
    %55 = vector.load %arg11[%c0_33, %c0_34] : memref<1x4xf32, #tpu.memory_space<vmem>>, vector<1x4xf32>
    %56 = vector.broadcast %55 : vector<1x4xf32> to vector<16x4xf32>
    %57 = arith.mulf %54, %56 : vector<16x4xf32>
    %c0_35 = arith.constant 0 : index
    %c0_36 = arith.constant 0 : index
    %58 = vector.load %arg12[%c0_35, %c0_36] : memref<1x4xf32, #tpu.memory_space<vmem>>, vector<1x4xf32>
    %59 = vector.broadcast %58 : vector<1x4xf32> to vector<16x4xf32>
    %60 = arith.addf %57, %59 : vector<16x4xf32>
    %cst_37 = arith.constant dense<0xFF800000> : vector<16xf32>
    %61 = vector.multi_reduction <maximumf>, %60, %cst_37 [1] : vector<16x4xf32> to vector<16xf32>
    %62 = vector.shape_cast %61 : vector<16xf32> to vector<16x1xf32>
    %63 = vector.broadcast %62 : vector<16x1xf32> to vector<16x4xf32>
    %64 = arith.subf %60, %63 : vector<16x4xf32>
    %65 = math.exp %64 : vector<16x4xf32>
    %cst_38 = arith.constant dense<0.000000e+00> : vector<16xf32>
    %66 = vector.multi_reduction <add>, %65, %cst_38 [1] : vector<16x4xf32> to vector<16xf32>
    %67 = vector.shape_cast %66 : vector<16xf32> to vector<16x1xf32>
    %68 = vector.broadcast %67 : vector<16x1xf32> to vector<16x4xf32>
    %69 = arith.divf %65, %68 : vector<16x4xf32>
    %c0_39 = arith.constant 0 : index
    %c0_40 = arith.constant 0 : index
    %70 = vector.load %arg13[%c0_39, %c0_40] : memref<128x256xf32, #tpu.memory_space<vmem>>, vector<128x256xf32>
    %cst_41 = arith.constant dense<0.000000e+00> : vector<16x256xf32>
    %71 = tpu.matmul %0, %70, %cst_41 {dimension_numbers = #tpu.dot_dimension_numbers<[1], [0], [0], [1], [0, 0, 1, 1], [], []>} : vector<16x128xf32>, vector<128x256xf32>, vector<16x256xf32> -> vector<16x256xf32>
    %c0_42 = arith.constant 0 : index
    %c0_43 = arith.constant 0 : index
    %72 = vector.load %arg14[%c0_42, %c0_43] : memref<1x256xf32, #tpu.memory_space<vmem>>, vector<1x256xf32>
    %73 = vector.broadcast %72 : vector<1x256xf32> to vector<16x256xf32>
    %74 = arith.addf %71, %73 : vector<16x256xf32>
    %75 = vector.extract_strided_slice %74 {offsets = [0, 0], sizes = [16, 128], strides = [1, 1]} : vector<16x256xf32> to vector<16x128xf32>
    %76 = vector.extract_strided_slice %74 {offsets = [0, 128], sizes = [16, 128], strides = [1, 1]} : vector<16x256xf32> to vector<16x128xf32>
    %c0_44 = arith.constant 0 : index
    %c0_45 = arith.constant 0 : index
    %77 = vector.load %arg15[%c0_44, %c0_45] : memref<128x128xf32, #tpu.memory_space<vmem>>, vector<128x128xf32>
    %cst_46 = arith.constant dense<0.000000e+00> : vector<16x128xf32>
    %78 = tpu.matmul %75, %77, %cst_46 {dimension_numbers = #tpu.dot_dimension_numbers<[1], [0], [0], [1], [0, 0, 1, 1], [], []>} : vector<16x128xf32>, vector<128x128xf32>, vector<16x128xf32> -> vector<16x128xf32>
    %c0_47 = arith.constant 0 : index
    %c0_48 = arith.constant 0 : index
    %79 = vector.load %arg16[%c0_47, %c0_48] : memref<1x128xf32, #tpu.memory_space<vmem>>, vector<1x128xf32>
    %80 = vector.broadcast %79 : vector<1x128xf32> to vector<16x128xf32>
    %81 = arith.addf %78, %80 : vector<16x128xf32>
    %cst_49 = arith.constant 0.000000e+00 : f32
    %82 = vector.broadcast %cst_49 : f32 to vector<16x128xf32>
    %83 = arith.cmpf ogt, %81, %82 : vector<16x128xf32>
    %84 = math.exp %81 : vector<16x128xf32>
    %cst_50 = arith.constant 1.000000e+00 : f32
    %85 = vector.broadcast %cst_50 : f32 to vector<16x128xf32>
    %86 = arith.subf %84, %85 : vector<16x128xf32>
    %87 = arith.select %83, %81, %86 : vector<16x128xi1>, vector<16x128xf32>
    %c0_51 = arith.constant 0 : index
    %c0_52 = arith.constant 0 : index
    %88 = vector.load %arg17[%c0_51, %c0_52] : memref<128x128xf32, #tpu.memory_space<vmem>>, vector<128x128xf32>
    %cst_53 = arith.constant dense<0.000000e+00> : vector<16x128xf32>
    %89 = tpu.matmul %87, %88, %cst_53 {dimension_numbers = #tpu.dot_dimension_numbers<[1], [0], [0], [1], [0, 0, 1, 1], [], []>} : vector<16x128xf32>, vector<128x128xf32>, vector<16x128xf32> -> vector<16x128xf32>
    %c0_54 = arith.constant 0 : index
    %c0_55 = arith.constant 0 : index
    %90 = vector.load %arg18[%c0_54, %c0_55] : memref<1x128xf32, #tpu.memory_space<vmem>>, vector<1x128xf32>
    %91 = vector.broadcast %90 : vector<1x128xf32> to vector<16x128xf32>
    %92 = arith.addf %89, %91 : vector<16x128xf32>
    %cst_56 = arith.constant 0.000000e+00 : f32
    %93 = vector.broadcast %cst_56 : f32 to vector<16x128xf32>
    %94 = arith.subf %93, %92 : vector<16x128xf32>
    %95 = math.exp %94 : vector<16x128xf32>
    %cst_57 = arith.constant 1.000000e+00 : f32
    %96 = vector.broadcast %cst_57 : f32 to vector<16x128xf32>
    %97 = arith.addf %96, %95 : vector<16x128xf32>
    %cst_58 = arith.constant 1.000000e+00 : f32
    %98 = vector.broadcast %cst_58 : f32 to vector<16x128xf32>
    %99 = arith.divf %98, %97 : vector<16x128xf32>
    %100 = arith.mulf %87, %99 : vector<16x128xf32>
    %101 = arith.addf %100, %76 : vector<16x128xf32>
    %c0_59 = arith.constant 0 : index
    %c0_60 = arith.constant 0 : index
    %102 = vector.load %arg21[%c0_59, %c0_60] : memref<128x128xf32, #tpu.memory_space<vmem>>, vector<128x128xf32>
    %cst_61 = arith.constant dense<0.000000e+00> : vector<16x128xf32>
    %103 = tpu.matmul %101, %102, %cst_61 {dimension_numbers = #tpu.dot_dimension_numbers<[1], [0], [0], [1], [0, 0, 1, 1], [], []>} : vector<16x128xf32>, vector<128x128xf32>, vector<16x128xf32> -> vector<16x128xf32>
    %104 = arith.subf %101, %103 : vector<16x128xf32>
    %105 = arith.mulf %104, %104 : vector<16x128xf32>
    %c0_62 = arith.constant 0 : index
    %c0_63 = arith.constant 0 : index
    %106 = vector.load %arg21[%c0_62, %c0_63] : memref<128x128xf32, #tpu.memory_space<vmem>>, vector<128x128xf32>
    %cst_64 = arith.constant dense<0.000000e+00> : vector<16x128xf32>
    %107 = tpu.matmul %105, %106, %cst_64 {dimension_numbers = #tpu.dot_dimension_numbers<[1], [0], [0], [1], [0, 0, 1, 1], [], []>} : vector<16x128xf32>, vector<128x128xf32>, vector<16x128xf32> -> vector<16x128xf32>
    %cst_65 = arith.constant 9.99999974E-6 : f32
    %108 = vector.broadcast %cst_65 : f32 to vector<16x128xf32>
    %109 = arith.addf %107, %108 : vector<16x128xf32>
    %110 = math.rsqrt %109 : vector<16x128xf32>
    %111 = arith.mulf %104, %110 : vector<16x128xf32>
    %c0_66 = arith.constant 0 : index
    %c0_67 = arith.constant 0 : index
    %112 = vector.load %arg19[%c0_66, %c0_67] : memref<1x128xf32, #tpu.memory_space<vmem>>, vector<1x128xf32>
    %113 = vector.broadcast %112 : vector<1x128xf32> to vector<16x128xf32>
    %114 = arith.mulf %111, %113 : vector<16x128xf32>
    %c0_68 = arith.constant 0 : index
    %c0_69 = arith.constant 0 : index
    %115 = vector.load %arg20[%c0_68, %c0_69] : memref<1x128xf32, #tpu.memory_space<vmem>>, vector<1x128xf32>
    %116 = vector.broadcast %115 : vector<1x128xf32> to vector<16x128xf32>
    %117 = arith.addf %114, %116 : vector<16x128xf32>
    %c0_70 = arith.constant 0 : index
    %c0_71 = arith.constant 0 : index
    %118 = vector.load %arg22[%c0_70, %c0_71] : memref<4x128xf32, #tpu.memory_space<vmem>>, vector<4x128xf32>
    %cst_72 = arith.constant dense<0.000000e+00> : vector<16x128xf32>
    %119 = tpu.matmul %69, %118, %cst_72 {dimension_numbers = #tpu.dot_dimension_numbers<[1], [0], [0], [1], [0, 0, 1, 1], [], []>} : vector<16x4xf32>, vector<4x128xf32>, vector<16x128xf32> -> vector<16x128xf32>
    %120 = arith.mulf %117, %119 : vector<16x128xf32>
    %c0_73 = arith.constant 0 : index
    %c0_74 = arith.constant 0 : index
    %121 = vector.load %arg23[%c0_73, %c0_74] : memref<128x128xf32, #tpu.memory_space<vmem>>, vector<128x128xf32>
    %cst_75 = arith.constant dense<0.000000e+00> : vector<16x128xf32>
    %122 = tpu.matmul %120, %121, %cst_75 {dimension_numbers = #tpu.dot_dimension_numbers<[1], [0], [0], [1], [0, 0, 1, 1], [], []>} : vector<16x128xf32>, vector<128x128xf32>, vector<16x128xf32> -> vector<16x128xf32>
    %c0_76 = arith.constant 0 : index
    %c0_77 = arith.constant 0 : index
    %123 = vector.load %arg24[%c0_76, %c0_77] : memref<4x128xf32, #tpu.memory_space<vmem>>, vector<4x128xf32>
    %cst_78 = arith.constant dense<0.000000e+00> : vector<16x128xf32>
    %124 = tpu.matmul %69, %123, %cst_78 {dimension_numbers = #tpu.dot_dimension_numbers<[1], [0], [0], [1], [0, 0, 1, 1], [], []>} : vector<16x4xf32>, vector<4x128xf32>, vector<16x128xf32> -> vector<16x128xf32>
    %125 = arith.addf %122, %124 : vector<16x128xf32>
    %c0_79 = arith.constant 0 : index
    %c0_80 = arith.constant 0 : index
    %126 = vector.load %arg25[%c0_79, %c0_80] : memref<16x128xf32, #tpu.memory_space<vmem>>, vector<16x128xf32>
    tpu.vector_store %arg25[%c0_79, %c0_80], %125 {strides = array<i32>} : memref<16x128xf32, #tpu.memory_space<vmem>>, vector<16x128xf32>,
    return
  }
  func.func @transform_0(%arg0: i32) -> (i32, i32) {
    %c0_i32 = arith.constant 0 : i32
    %c0_i32_0 = arith.constant 0 : i32
    return %arg0, %c0_i32 : i32, i32
  }
  func.func @transform_1(%arg0: i32) -> (i32, i32) {
    %c0_i32 = arith.constant 0 : i32
    %c0_i32_0 = arith.constant 0 : i32
    return %arg0, %c0_i32 : i32, i32
  }
  func.func @transform_2(%arg0: i32) -> (i32, i32) {
    %c0_i32 = arith.constant 0 : i32
    %c0_i32_0 = arith.constant 0 : i32
    %c0_i32_1 = arith.constant 0 : i32
    return %c0_i32, %c0_i32_0 : i32, i32
  }
  func.func @transform_3(%arg0: i32) -> (i32, i32) {
    %c0_i32 = arith.constant 0 : i32
    %c0_i32_0 = arith.constant 0 : i32
    %c0_i32_1 = arith.constant 0 : i32
    return %c0_i32, %c0_i32_0 : i32, i32
  }
  func.func @transform_4(%arg0: i32) -> (i32, i32) {
    %c0_i32 = arith.constant 0 : i32
    %c0_i32_0 = arith.constant 0 : i32
    %c0_i32_1 = arith.constant 0 : i32
    return %c0_i32, %c0_i32_0 : i32, i32
  }
  func.func @transform_5(%arg0: i32) -> (i32, i32) {
    %c0_i32 = arith.constant 0 : i32
    %c0_i32_0 = arith.constant 0 : i32
    %c0_i32_1 = arith.constant 0 : i32
    return %c0_i32, %c0_i32_0 : i32, i32
  }
  func.func @transform_6(%arg0: i32) -> (i32, i32) {
    %c0_i32 = arith.constant 0 : i32
    %c0_i32_0 = arith.constant 0 : i32
    %c0_i32_1 = arith.constant 0 : i32
    return %c0_i32, %c0_i32_0 : i32, i32
  }
  func.func @transform_7(%arg0: i32) -> (i32, i32) {
    %c0_i32 = arith.constant 0 : i32
    %c0_i32_0 = arith.constant 0 : i32
    %c0_i32_1 = arith.constant 0 : i32
    return %c0_i32, %c0_i32_0 : i32, i32
  }
  func.func @transform_8(%arg0: i32) -> (i32, i32) {
    %c0_i32 = arith.constant 0 : i32
    %c0_i32_0 = arith.constant 0 : i32
    %c0_i32_1 = arith.constant 0 : i32
    return %c0_i32, %c0_i32_0 : i32, i32
  }
  func.func @transform_9(%arg0: i32) -> (i32, i32) {
    %c0_i32 = arith.constant 0 : i32
    %c0_i32_0 = arith.constant 0 : i32
    %c0_i32_1 = arith.constant 0 : i32
    return %c0_i32, %c0_i32_0 : i32, i32
  }
  func.func @transform_10(%arg0: i32) -> (i32, i32) {
    %c0_i32 = arith.constant 0 : i32
    %c0_i32_0 = arith.constant 0 : i32
    %c0_i32_1 = arith.constant 0 : i32
    return %c0_i32, %c0_i32_0 : i32, i32
  }
  func.func @transform_11(%arg0: i32) -> (i32, i32) {
    %c0_i32 = arith.constant 0 : i32
    %c0_i32_0 = arith.constant 0 : i32
    %c0_i32_1 = arith.constant 0 : i32
    return %c0_i32, %c0_i32_0 : i32, i32
  }
  func.func @transform_12(%arg0: i32) -> (i32, i32) {
    %c0_i32 = arith.constant 0 : i32
    %c0_i32_0 = arith.constant 0 : i32
    %c0_i32_1 = arith.constant 0 : i32
    return %c0_i32, %c0_i32_0 : i32, i32
  }
  func.func @transform_13(%arg0: i32) -> (i32, i32) {
    %c0_i32 = arith.constant 0 : i32
    %c0_i32_0 = arith.constant 0 : i32
    %c0_i32_1 = arith.constant 0 : i32
    return %c0_i32, %c0_i32_0 : i32, i32
  }
  func.func @transform_14(%arg0: i32) -> (i32, i32) {
    %c0_i32 = arith.constant 0 : i32
    %c0_i32_0 = arith.constant 0 : i32
    %c0_i32_1 = arith.constant 0 : i32
    return %c0_i32, %c0_i32_0 : i32, i32
  }
  func.func @transform_15(%arg0: i32) -> (i32, i32) {
    %c0_i32 = arith.constant 0 : i32
    %c0_i32_0 = arith.constant 0 : i32
    %c0_i32_1 = arith.constant 0 : i32
    return %c0_i32, %c0_i32_0 : i32, i32
  }
  func.func @transform_16(%arg0: i32) -> (i32, i32) {
    %c0_i32 = arith.constant 0 : i32
    %c0_i32_0 = arith.constant 0 : i32
    %c0_i32_1 = arith.constant 0 : i32
    return %c0_i32, %c0_i32_0 : i32, i32
  }
  func.func @transform_17(%arg0: i32) -> (i32, i32) {
    %c0_i32 = arith.constant 0 : i32
    %c0_i32_0 = arith.constant 0 : i32
    %c0_i32_1 = arith.constant 0 : i32
    return %c0_i32, %c0_i32_0 : i32, i32
  }
  func.func @transform_18(%arg0: i32) -> (i32, i32) {
    %c0_i32 = arith.constant 0 : i32
    %c0_i32_0 = arith.constant 0 : i32
    %c0_i32_1 = arith.constant 0 : i32
    return %c0_i32, %c0_i32_0 : i32, i32
  }
  func.func @transform_19(%arg0: i32) -> (i32, i32) {
    %c0_i32 = arith.constant 0 : i32
    %c0_i32_0 = arith.constant 0 : i32
    %c0_i32_1 = arith.constant 0 : i32
    return %c0_i32, %c0_i32_0 : i32, i32
  }
  func.func @transform_20(%arg0: i32) -> (i32, i32) {
    %c0_i32 = arith.constant 0 : i32
    %c0_i32_0 = arith.constant 0 : i32
    %c0_i32_1 = arith.constant 0 : i32
    return %c0_i32, %c0_i32_0 : i32, i32
  }
  func.func @transform_21(%arg0: i32) -> (i32, i32) {
    %c0_i32 = arith.constant 0 : i32
    %c0_i32_0 = arith.constant 0 : i32
    %c0_i32_1 = arith.constant 0 : i32
    return %c0_i32, %c0_i32_0 : i32, i32
  }
  func.func @transform_22(%arg0: i32) -> (i32, i32) {
    %c0_i32 = arith.constant 0 : i32
    %c0_i32_0 = arith.constant 0 : i32
    %c0_i32_1 = arith.constant 0 : i32
    return %c0_i32, %c0_i32_0 : i32, i32
  }
  func.func @transform_23(%arg0: i32) -> (i32, i32) {
    %c0_i32 = arith.constant 0 : i32
    %c0_i32_0 = arith.constant 0 : i32
    %c0_i32_1 = arith.constant 0 : i32
    return %c0_i32, %c0_i32_0 : i32, i32
  }
  func.func @transform_24(%arg0: i32) -> (i32, i32) {
    %c0_i32 = arith.constant 0 : i32
    %c0_i32_0 = arith.constant 0 : i32
    return %arg0, %c0_i32 : i32, i32
  }
}

</mosaic_0001>

<bundles_post_ra>
// kernel: tpu_custom_call.1
= control target key start
LH: loop header
LB: loop body
LE: loop exit
PB: predicated region body
PF: predicated region fallthrough
CT: control target
= control target key end

     0   :  { %s2714_s0 = inlined_call_operand.vmem [shape: f32[64,128], index: 0, kind: input, shape index: {}]   ;;  %s2715_s1 = inlined_call_operand.vmem [shape: f32[64,16], index: 1, kind: input, shape index: {}]   ;;  %s2716_s2 = inlined_call_operand.vmem [shape: f32[128,32], index: 2, kind: input, shape index: {}]   ;;  %s2717_s3 = inlined_call_operand.vmem [shape: f32[1,32], index: 3, kind: input, shape index: {}]   ;;  %s2718_s4 = inlined_call_operand.vmem [shape: f32[16,32], index: 4, kind: input, shape index: {}]   ;;  %s2719_s5 = inlined_call_operand.vmem [shape: f32[32,4], index: 5, kind: input, shape index: {}]   ;;  %s2720_s6 = inlined_call_operand.vmem [shape: f32[1,4], index: 6, kind: input, shape index: {}]   ;;  %s2721_s7 = inlined_call_operand.vmem [shape: f32[4,4], index: 7, kind: input, shape index: {}]   ;;  %s2722_s8 = inlined_call_operand.vmem [shape: f32[1,4], index: 8, kind: input, shape index: {}]   ;;  %s2723_s9 = inlined_call_operand.vmem [shape: f32[128,4], index: 9, kind: input, shape index: {}]   ;;  %s2724_s10 = inlined_call_operand.vmem [shape: f32[1,4], index: 10, kind: input, shape index: {}]   ;;  %s2725_s11 = inlined_call_operand.vmem [shape: f32[1,4], index: 11, kind: input, shape index: {}]   ;;  %s2726_s12 = inlined_call_operand.vmem [shape: f32[128,256], index: 12, kind: input, shape index: {}]   ;;  %s2727_s13 = inlined_call_operand.vmem [shape: f32[1,256], index: 13, kind: input, shape index: {}]   ;;  %s2728_s14 = inlined_call_operand.hbm [shape: f32[128,128], index: 14, kind: input, shape index: {}]   ;;  %s2729_s15 = inlined_call_operand.vmem [shape: f32[1,128], index: 15, kind: input, shape index: {}]   ;;  %s2730_s16 = inlined_call_operand.hbm [shape: f32[128,128], index: 16, kind: input, shape index: {}]   ;;  %s2731_s17 = inlined_call_operand.vmem [shape: f32[1,128], index: 17, kind: input, shape index: {}]   ;;  %s2732_s18 = inlined_call_operand.vmem [shape: f32[1,128], index: 18, kind: input, shape index: {}]   ;;  %s2733_s19 = inlined_call_operand.vmem [shape: f32[1,128], index: 19, kind: input, shape index: {}]   ;;  %s2734_s20 = inlined_call_operand.hbm [shape: f32[128,128], index: 20, kind: input, shape index: {}]   ;;  %s2735_s21 = inlined_call_operand.vmem [shape: f32[4,128], index: 21, kind: input, shape index: {}]   ;;  %s2736_s22 = inlined_call_operand.hbm [shape: f32[128,128], index: 22, kind: input, shape index: {}]   ;;  %s2737_s23 = inlined_call_operand.vmem [shape: f32[4,128], index: 23, kind: input, shape index: {}]   ;;  %s2738_s24 = inlined_call_operand.hbm [shape: f32[64,128], index: 24, kind: output, shape index: {}]  }
   0x1   :  { %2753 = sst [smem:[#allocation22_spill]] %s2714_s0 }
   0x2   :  { %2754 = sst [smem:[#allocation23_spill]] %s2715_s1 }
   0x3   :  { %2755 = sst [smem:[#allocation24_spill]] %s2716_s2 }
   0x4   :  { %2756 = sst [smem:[#allocation25_spill]] %s2717_s3 }
   0x5   :  { %2757 = sst [smem:[#allocation26_spill]] %s2718_s4 }
   0x6   :  { %2758 = sst [smem:[#allocation27_spill]] %s2719_s5 }
   0x7   :  { %2759 = sst [smem:[#allocation28_spill]] %s2720_s6 }
   0x8   :  { %2760 = sst [smem:[#allocation29_spill]] %s2721_s7 }
   0x9   :  { %2761 = sst [smem:[#allocation30_spill]] %s2722_s8 }
   0xa   :  { %2762 = sst [smem:[#allocation31_spill]] %s2728_s14 }
   0xb   :  { %2763 = sst [smem:[#allocation32_spill]] %s2730_s16 }
   0xc   :  { %2764 = sst [smem:[#allocation33_spill]] %s2733_s19 }
   0xd   :  { %2765 = sst [smem:[#allocation34_spill]] %s2738_s24 }
   0xe   :  { %29 = vsyncpa [#allocation3], 0 }
   0xf   :  { %30 = vsyncpa [#allocation6], 0 }
  0x10   :  { %31 = vsyncpa [#allocation9], 0 }
  0x11   :  { %32 = vsyncpa [#allocation4], 0 }
  0x12   :  { %34 = vsyncpa [#allocation4 + $0x1], 0  ;;  %s2251_s5 = smov 0   ;;  %s2253_s26 = smov 0  }
  0x13   :  { %s2255_s27 = smov 0   ;;  %s2257_s28 = smov 0  }
  0x14 LB: > { %2766 = sst [smem:[#allocation15_spill]] %s2103_s5  ;;  %s2272_s6 = sadd.s32 4294967295, %s2115_s28   ;;  %s2115_s28 = sphi %s2257_s28, %s2796_s28   ;;  %s2111_s27 = sphi %s2255_s27, %s2798_s27   ;;  %s2107_s26 = sphi %s2253_s26, %s2800_s26   ;;  %s2103_s5 = sphi %s2251_s5, %s2799_s5  }
  0x15   : > { %2767 = sst [smem:[#allocation16_spill]] %s2111_s27  ;;  %s1744_s2 = sadd.s32 4294967294, %s2115_s28  }
  0x16   : > { %2768 = sst [smem:[#allocation17_spill]] %s2115_s28  ;;  %s2276_s29 = sadd.s32 1, %s2115_s28  }
  0x17   : > { %2769 = sst [smem:[#allocation18_spill]] %s2276_s29  ;;  %s561_s0 = sadd.s32 1, %s2111_s27 }
  0x18   : > { %s558_s7 = ssub.s32 %s2115_s28, %s2276_s29  ;;  %p571_p0 = scmp.ne.s32.totalorder %s2111_s27, %s2107_s26 }
  0x19   : > { %p559_p1 = scmp.eq.s32.totalorder %s558_s7, 0  ;;  %p572_p2 = scmp.eq.s32.totalorder %s2272_s6, 3 }
  0x1a   : > { %p577_p3 = scmp.ne.s32.totalorder %s2107_s26, %s2103_s5  ;;  %p578_p4 = scmp.eq.s32.totalorder %s1744_s2, 3 }
  0x1b   : > { %s2287_s30 = scalar_select %p559_p1, %s2111_s27, %s561_s0  }
  0x1c   : > { %p2289_p5 = por %p572_p2, %p571_p0  ;;  %p2293_p6 = por %p578_p4, %p577_p3 }
  0x1d   : > { %2770 = sst [smem:[#allocation19_spill]] %s2287_s30  ;;  %p1745_p7 = scmp.ge.s32.totalorder %s2115_s28, 1 }
  0x1e   : > { %s2771_s3 = scalar_select %p2289_p5, 1, 0 }
  0x1f   : > { %s2773_s25 = scalar_select %p2293_p6, 1, 0 }
  0x20   : > { %2772 = sst [smem:[#allocation20_spill]] %s2771_s3  ;;  %p585_p8 = scmp.lt.s32.totalorder %s2115_s28, 5 }
  0x21   : > { %2774 = sst [smem:[#allocation21_spill]] %s2773_s25  ;;  %p1820_p9 = scmp.eq.s32.totalorder %s2272_s6, 0 }
  0x22   : > { %p2300_p10 = pnand %p1745_p7, %p585_p8  ;;  %s2776_s16 = sld [smem:[#allocation32_spill]] }
  0x23   : > { %s2777_s14 = sld [smem:[#allocation31_spill]]  ;;  %s2117_s29 = smov [#allocation5]  }
  0x24   : > { %p1803_p11 = pneg %p2300_p10  ;;  %s651_s25 = sshll.u32 %s2117_s29, 4  ;;  %s652_s25 = int_to_ptr.vmem [resolvable:$true] %s651_s25 }
  0x25   : > { %s2118_s4 = smov 128   ;;  %s2119_s1 = smov 8  }
  0x26   : > { %p2314_p12 = pnand %p1820_p9, %p1803_p11  ;;  %s672_s5 = sshll.u32 %s2734_s20, 4  ;;  %s673_s5 = int_to_ptr.hbm [resolvable:$true] %s672_s5 }
  0x27   : > { %s689_s24 = sshll.u32 %s2736_s22, 4  ;;  %s2121_s3 = smov [#allocation7]   ;;  %s690_s24 = int_to_ptr.hbm [resolvable:$true] %s689_s24 }
  0x28   : > { %s649_s2 = sshll.u32 %s2776_s16, 4  ;;  %s2120_s16 = smov [#allocation2]   ;;  %s650_s2 = int_to_ptr.hbm [resolvable:$true] %s649_s2 }
  0x29   : > { %s632_s30 = sshll.u32 %s2777_s14, 4  ;;  %s634_s0 = sshll.u32 %s2120_s16, 4  ;;  %s633_s30 = int_to_ptr.hbm [resolvable:$true] %s632_s30  ;;  %s635_s0 = int_to_ptr.vmem [resolvable:$true] %s634_s0 }
  0x2a   : > { %1809 = dma.hbm_to_vmem [thread:$0]  (!%p2314_p12), %s650_s2, 2048, %s652_s25, [#allocation6], %s2118_s4, %s2118_s4, %s2119_s1  }
  0x2b   : > { %1806 = dma.hbm_to_vmem [thread:$0]  (!%p2314_p12), %s633_s30, 2048, %s635_s0, [#allocation3], %s2118_s4, %s2118_s4, %s2119_s1  }
  0x2c   : > { %s674_s19 = sshll.u32 %s2121_s3, 4  ;;  %s2122_s25 = smov [#allocation8]   ;;  %s675_s19 = int_to_ptr.vmem [resolvable:$true] %s674_s19 }
  0x2d   : > { %1812 = dma.hbm_to_vmem [thread:$0]  (!%p2314_p12), %s673_s5, 2048, %s675_s19, [#allocation6], %s2118_s4, %s2118_s4, %s2119_s1  }
  0x2e   : > { %s691_s16 = sshll.u32 %s2122_s25, 4  ;;  %728 = sbr.rel (%p2300_p10) target bundleno = 1338 (0x53a), region = 116  ;;  %s692_s16 = int_to_ptr.vmem [resolvable:$true] %s691_s16 }
  0x2f   : > { %1815 = dma.hbm_to_vmem [thread:$0]  (!%p2314_p12), %s690_s24, 2048, %s692_s16, [#allocation9], %s2118_s4, %s2118_s4, %s2119_s1  }
  0x33   : > { %2086 = dma.done.wait (%p1820_p9), [#allocation3], 2048  }
  0x34   : > { %2088 = vsyncadd (%p1820_p9), [#allocation3], 4294965248 }
  0x35   : > { %2090 = dma.done.wait (%p1820_p9), [#allocation6], 4096  }
  0x36   : > { %2092 = vsyncadd (%p1820_p9), [#allocation6], 4294963200 }
  0x37   : > { %2094 = dma.done.wait (%p1820_p9), [#allocation9], 2048  }
  0x38   : > { %2096 = vsyncadd (%p1820_p9), [#allocation9], 4294965248  ;;  %s1757_s14 = sshll.u32 %s2272_s6, 1  ;;  %s2779_s5 = sld [smem:[#allocation24_spill]]  ;;  %v1218_v3 = vld [vmem:[%s2726_s12 + $0xf0] sm:$0xff]  ;;  %v1216_v4 = vld [vmem:[%s2726_s12 + $0xe0] sm:$0xff] }
  0x39   : > { %p816_p13 = scmp.lt.s32.totalorder %s1757_s14, 7  ;;  %1226 = vmatpush.msra.mxu3 %v1218_v3  ;;  %v1214_v6 = vld [vmem:[%s2726_s12 + $0xd0] sm:$0xff]  ;;  %v1212_v8 = vld [vmem:[%s2726_s12 + $0xc0] sm:$0xff]  ;;  %s2781_s2 = sld [smem:[#allocation26_spill]]  ;;  %vm916_vm0 = vcmask 130048   ;;  %v847_v18 = vld [vmem:[%s2723_s9 + $0x78] sm:$0xff] }
  0x3a   : > { %s2782_s0 = sld [smem:[#allocation23_spill]]  ;;  %v1210_v12 = vld [vmem:[%s2726_s12 + $0xb0] sm:$0xff]  ;;  %v1208_v15 = vld [vmem:[%s2726_s12 + $0xa0] sm:$0xff]  ;;  %848 = vmatpush.msra.mxu0 %v847_v18  ;;  %v845_v22 = vld [vmem:[%s2723_s9 + $0x68] sm:$0xff]  ;;  %vm1008_vm1 = vcmask 1043456   ;;  %vm956_vm2 = vcmask 261120  }
  0x3b   : > { %s2802_s14 = smov (!%p816_p13, %s1757_s14), 7  ;;  %1227 = vmatpush.msra.mxu3 %v1216_v4  ;;  %v1206_v17 = vld [vmem:[%s2726_s12 + $0x90] sm:$0xff]  ;;  %v1204_v21 = vld [vmem:[%s2726_s12 + $0x80] sm:$0xff]  ;;  %v843_v31 = vld [vmem:[%s2723_s9 + $0x58] sm:$0xff]  ;;  %s2783_s8 = sld [smem:[#allocation22_spill]]  ;;  %vm1001_vm3 = vcmask 31744  }
  0x3c   : > { %s1758_s7 = sshll.u32 %s2802_s14, 3  ;;  %v846_v19 = vld [vmem:[%s2723_s9 + $0x70] sm:$0xff]  ;;  %v844_v26 = vld [vmem:[%s2723_s9 + $0x60] sm:$0xff]  ;;  %v841_v35 = vld [vmem:[%s2723_s9 + $0x48] sm:$0xff]  ;;  %s2784_s28 = sld [smem:[#allocation27_spill]] }
  0x3d   : > { %1228 = vmatpush.msra.mxu3 %v1214_v6  ;;  %v1202_v24 = vld [vmem:[%s2726_s12 + $0x70] sm:$0xff]  ;;  %849 = vmatpush.msra.mxu0 %v846_v19  ;;  %v1200_v29 = vld [vmem:[%s2726_s12 + $0x60] sm:$0xff]  ;;  %v839_v41 = vld [vmem:[%s2723_s9 + $0x38] sm:$0xff]  ;;  %s2786_s24 = sld [smem:[#allocation25_spill]]  ;;  %s1783_s1 = sshll.u32 %s2272_s6, 4 }
  0x3e   : > { %s2780_s30 = smov %s2779_s5  ;;  %v886_v0 = vld [vmem:[%s2779_s5 + $0x78] sm:$0xff]  ;;  %v1198_v30 = vld [vmem:[%s2726_s12 + $0x50] sm:$0xff]  ;;  %v1196_v34 = vld [vmem:[%s2726_s12 + $0x40] sm:$0xff]  ;;  %s2788_s19 = sld [smem:[#allocation28_spill]] }
  0x3f   : > { %v885_v1 = vld [vmem:[%s2780_s30 + $0x70] sm:$0xff]  ;;  %891 = vmatpush.msra.mxu1 %v886_v0  ;;  %v884_v2 = vld [vmem:[%s2780_s30 + $0x68] sm:$0xff]  ;;  %v883_v5 = vld [vmem:[%s2780_s30 + $0x60] sm:$0xff]  ;;  %1229 = vmatpush.msra.mxu3 %v1212_v8  ;;  %s2790_s27 = sld [smem:[#allocation33_spill]] }
  0x40   : > { %v882_v7 = vld [vmem:[%s2780_s30 + $0x58] sm:$0xff]  ;;  %v915_v9 = vld [vmem:[%s2781_s2 + $0x8] sm:$0xff]  ;;  %s2385_s29 = scalar_lea.vmem %s2782_s0, %s1758_s7  ;;  %v914_v10 = vld [vmem:[%s2781_s2] sm:$0xff]  ;;  %850 = vmatpush.msra.mxu0 %v845_v22 }
  0x41   : > { %892 = vmatpush.msra.mxu1 %v885_v1  ;;  %v881_v11 = vld [vmem:[%s2780_s30 + $0x50] sm:$0xff]  ;;  %937 = vmatpush.msra.mxu2 %v915_v9  ;;  %v830_v13 = vld [vmem:[%s2385_s29] sm:$0xff]  ;;  %v880_v14 = vld [vmem:[%s2780_s30 + $0x48] sm:$0xff]  ;;  %s819_s4 = scalar_lea.vmem %s2783_s8, %s1758_s7 }
  0x42   : > { %1230 = vmatpush.msra.mxu3 %v1210_v12  ;;  %v879_v16 = vld [vmem:[%s2780_s30 + $0x40] sm:$0xff]  ;;  %v878_v20 = vld [vmem:[%s2780_s30 + $0x38] sm:$0xff]  ;;  %v877_v23 = vld [vmem:[%s2780_s30 + $0x30] sm:$0xff]  ;;  %851 = vmatpush.msra.mxu0 %v844_v26  ;;  %s2785_s3 = smov %s2784_s28 }
  0x43   : > { %893 = vmatpush.msra.mxu1 %v884_v2  ;;  %938 = vmatpush.msra.mxu2 %v914_v10  ;;  %v831_v25 = vld [vmem:[%s2385_s29 + $0x8] sm:$0xff]  ;;  %v875_v28 = vld [vmem:[%s2780_s30 + $0x20] sm:$0xff]  ;;  %v874_v32 = vld [vmem:[%s2780_s30 + $0x18] sm:$0xff] }
  0x44   : > { %1761 = vmatmul.msk.f32.vlgmr.msra.gmra.mxu2 %vm916_vm0, %v830_v13  ;;  %1231 = vmatpush.msra.mxu3 %v1208_v15  ;;  %v876_v27 = vld [vmem:[%s2780_s30 + $0x28] sm:$0xff]  ;;  %v842_v33 = vld [vmem:[%s2723_s9 + $0x50] sm:$0xff]  ;;  %v840_v38 = vld [vmem:[%s2723_s9 + $0x40] sm:$0xff] }
  0x45   : > { %894 = vmatpush.msra.mxu1 %v883_v5  ;;  %852 = vmatpush.msra.mxu0 %v843_v31  ;;  %v873_v36 = vld [vmem:[%s2780_s30 + $0x10] sm:$0xff]  ;;  %v872_v39 = vld [vmem:[%s2780_s30 + $0x8] sm:$0xff]  ;;  %v1192_v40 = vld [vmem:[%s2726_s12 + $0x20] sm:$0xff] }
  0x46   : > { %1232 = vmatpush.msra.mxu3 %v1206_v17  ;;  %v1194_v37 = vld [vmem:[%s2726_s12 + $0x30] sm:$0xff]  ;;  %v871_v42 = vld [vmem:[%s2780_s30] sm:$0xff]  ;;  %v837_v47 = vld [vmem:[%s2723_s9 + $0x28] sm:$0xff] }
  0x47   : > { %895 = vmatpush.msra.mxu1 %v882_v7  ;;  %853 = vmatpush.msra.mxu0 %v842_v33  ;;  %v1190_v43 = vld [vmem:[%s2726_s12 + $0x10] sm:$0xff]  ;;  %v2492_v44 = vld [vmem:[%s819_s4] sm:$0xff]  ;;  %v835_v49 = vld [vmem:[%s2723_s9 + $0x18] sm:$0xff] }
  0x48   : > { %1233 = vmatpush.msra.mxu3 %v1204_v21  ;;  %v838_v45 = vld [vmem:[%s2723_s9 + $0x30] sm:$0xff]  ;;  %v1188_v46 = vld [vmem:[%s2726_s12] sm:$0xff]  ;;  %v2511_v50 = vld [vmem:[%s819_s4 + $0x8] sm:$0xff]  ;;  %s2787_s4 = sld [smem:[#allocation29_spill]] }
  0x49   : > { %896 = vmatpush.msra.mxu1 %v881_v11  ;;  %854 = vmatpush.msra.mxu0 %v841_v35  ;;  %v836_v48 = vld [vmem:[%s2723_s9 + $0x20] sm:$0xff]  ;;  %v834_v51 = vld [vmem:[%s2723_s9 + $0x10] sm:$0xff]  ;;  %v833_v52 = vld [vmem:[%s2723_s9 + $0x8] sm:$0xff] }
  0x4a   : > { %1234 = vmatpush.msra.mxu3 %v1202_v24  ;;  %v832_v53 = vld [vmem:[%s2723_s9] sm:$0xff]  ;;  %v951_v54 = vld [vmem:[%s2784_s28 + $0x18] sm:$0xff]  ;;  %v950_v55 = vld [vmem:[%s2785_s3 + $0x10] sm:$0xff]  ;;  %s812_s28 = sand.u32 1, %s2107_s26  }
  0x4b   : > { %897 = vmatpush.msra.mxu1 %v880_v14  ;;  %855 = vmatpush.msra.mxu0 %v840_v38  ;;  %v949_v56 = vld [vmem:[%s2785_s3 + $0x8] sm:$0xff]  ;;  %v948_v57 = vld [vmem:[%s2785_s3] sm:$0xff]  ;;  %v1287_v58 = vld [vmem:[#allocation2 + $0x78] sm:$0xff]  ;;  %s1756_s8 = sshll.u32 %s812_s28, 4  ;;  %s1614_s5 = scalar_lea.sflag [#allocation4], %s812_s28 }
  0x4c   : > { %1762 = vmatmul.msk.f32.gmra.mxu2 %vm916_vm0, %v831_v25  ;;  %1235 = vmatpush.msra.mxu3 %v1200_v29  ;;  %v1286_v59 = vld [vmem:[#allocation2 + $0x70] sm:$0xff]  ;;  %v1285_v60 = vld [vmem:[#allocation2 + $0x68] sm:$0xff]  ;;  %v1284_v61 = vld [vmem:[#allocation2 + $0x60] sm:$0xff]  ;;  %s814_s0 = scalar_lea.vmem [#allocation10], %s1756_s8 }
  0x4d   : > { %898 = vmatpush.msra.mxu1 %v879_v16  ;;  %856 = vmatpush.msra.mxu0 %v839_v41  ;;  %v1283_v62 = vld [vmem:[#allocation2 + $0x58] sm:$0xff]  ;;  %v1282_v63 = vld [vmem:[#allocation2 + $0x50] sm:$0xff]  ;;  %v1281_v0 = vld [vmem:[#allocation2 + $0x48] sm:$0xff] }
  0x4e   : > { %1236 = vmatpush.msra.mxu3 %v1198_v30  ;;  %v1280_v1 = vld [vmem:[#allocation2 + $0x40] sm:$0xff]  ;;  %v1279_v2 = vld [vmem:[#allocation2 + $0x38] sm:$0xff]  ;;  %v1278_v3 = vld [vmem:[#allocation2 + $0x30] sm:$0xff] }
  0x4f   : > { %899 = vmatpush.msra.mxu1 %v878_v20  ;;  %857 = vmatpush.msra.mxu0 %v838_v45  ;;  %v1277_v4 = vld [vmem:[#allocation2 + $0x28] sm:$0xff]  ;;  %v1276_v5 = vld [vmem:[#allocation2 + $0x20] sm:$0xff]  ;;  %v1275_v6 = vld [vmem:[#allocation2 + $0x18] sm:$0xff] }
  0x50   : > { %1237 = vmatpush.msra.mxu3 %v1196_v34  ;;  %v1274_v7 = vld [vmem:[#allocation2 + $0x10] sm:$0xff]  ;;  %v1273_v8 = vld [vmem:[#allocation2 + $0x8] sm:$0xff]  ;;  %v1272_v9 = vld [vmem:[#allocation2] sm:$0xff] }
  0x51   : > { %900 = vmatpush.msra.mxu1 %v877_v23  ;;  %858 = vmatpush.msra.mxu0 %v837_v47  ;;  %v1870_v10 = vld [vmem:[%s2786_s24] ss:$0 sm:$0xff]  ;;  %v1340_v26 = vld [vmem:[#allocation5 + $0x78] sm:$0xff]  ;;  %v1335_v31 = vld [vmem:[#allocation5 + $0x50] sm:$0xff]  ;;  %s1626_s24 = sshll.u32 %s814_s0, 4  ;;  %s1627_s24 = int_to_ptr.vmem [resolvable:$true] %s1626_s24 }
  0x52   : > { %1238 = vmatpush.msra.mxu3 %v1194_v37  ;;  %v996_v11 = vld [vmem:[%s2787_s4] sm:$0xf]  ;;  %v1336_v30 = vld [vmem:[#allocation5 + $0x58] sm:$0xff]  ;;  %v1330_v37 = vld [vmem:[#allocation5 + $0x28] sm:$0xff]  ;;  %s2789_s4 = sld [smem:[#allocation30_spill]] }
  0x53   : > { %901 = vmatpush.msra.mxu1 %v876_v27  ;;  %859 = vmatpush.msra.mxu0 %v836_v48  ;;  %v2548_v19 = vld [vmem:[%s2727_s13] sm:$0x3]  ;;  %v1339_v27 = vld [vmem:[#allocation5 + $0x70] sm:$0xff]  ;;  %v1332_v35 = vld [vmem:[#allocation5 + $0x38] sm:$0xff] }
  0x54   : > { %1239 = vmatpush.msra.mxu3 %v1192_v40  ;;  %1767 = vmatpush.msk.msrb.mxu2 %vm1008_vm1, %v996_v11  ;;  %v1222_v22 = vperm.slane %v2548_v19, 0  ;;  %v1337_v29 = vld [vmem:[#allocation5 + $0x60] sm:$0xff]  ;;  %v1328_v40 = vld [vmem:[#allocation5 + $0x18] sm:$0xff]  ;;  %v1326_v45 = vld [vmem:[#allocation5 + $0x8] sm:$0xff] }
  0x55   : > { %902 = vmatpush.msra.mxu1 %v875_v28  ;;  %860 = vmatpush.msra.mxu0 %v835_v49  ;;  %v1338_v28 = vld [vmem:[#allocation5 + $0x68] sm:$0xff]  ;;  %v1333_v34 = vld [vmem:[#allocation5 + $0x40] sm:$0xff]  ;;  %v1219_v41 = vld [vmem:[%s2726_s12 + $0xf8] sm:$0xff] }
  0x56   : > { %1240 = vmatpush.msra.mxu3 %v1190_v43  ;;  %v1329_v38 = vld [vmem:[#allocation5 + $0x20] sm:$0xff]  ;;  %1249 = vmatpush.msra.mxu2 %v1219_v41  ;;  %v1217_v43 = vld [vmem:[%s2726_s12 + $0xe8] sm:$0xff]  ;;  %v1215_v47 = vld [vmem:[%s2726_s12 + $0xd8] sm:$0xff] }
  0x57   : > { %903 = vmatpush.msra.mxu1 %v874_v32  ;;  %861 = vmatpush.msra.mxu0 %v834_v51  ;;  %v1334_v32 = vld [vmem:[#allocation5 + $0x48] sm:$0xff]  ;;  %v1325_v48 = vld [vmem:[#allocation5] sm:$0xff]  ;;  %v1211_v51 = vld [vmem:[%s2726_s12 + $0xb8] sm:$0xff] }
  0x58   : > { %1241 = vmatpush.msra.mxu3 %v1188_v46  ;;  %1250 = vmatpush.msra.mxu2 %v1217_v43  ;;  %v1871_v46 = vld [vmem:[%s2788_s19] ss:$0 sm:$0xff]  ;;  %v1213_v49 = vld [vmem:[%s2726_s12 + $0xc8] sm:$0xff]  ;;  %v1191_v11 = vld [vmem:[%s2726_s12 + $0x18] sm:$0xff]  ;;  %s2792_s19 = sld [smem:[#allocation34_spill]] }
  0x59   : > { %904 = vmatpush.msra.mxu1 %v873_v36  ;;  %1242 = vmatmul.f32.vlgmr.msra.gmra.mxu3 %v2492_v44  ;;  %v1331_v36 = vld [vmem:[#allocation5 + $0x30] sm:$0xff]  ;;  %v1874_v43 = vld [vmem:[%s2731_s17] ss:$0 sm:$0xff] }
  0x5a   : > { %862 = vmatpush.msra.mxu0 %v833_v52  ;;  %1251 = vmatpush.msra.mxu2 %v1215_v47  ;;  %v1412_v47 = vld [vmem:[#allocation7 + $0x10] sm:$0xff] }
  0x5b   : > { %905 = vmatpush.msra.mxu1 %v872_v39 }
  0x5c   : > { %863 = vmatpush.msra.mxu0 %v832_v53  ;;  %1252 = vmatpush.msra.mxu2 %v1213_v49 }
  0x5d   : > { %906 = vmatpush.msra.mxu1 %v871_v42  ;;  %864 = vmatmul.f32.vlgmr.msra.gmra.mxu0 %v2492_v44  ;;  %v1327_v42 = vld [vmem:[#allocation5 + $0x10] sm:$0xff] }
  0x5e   : > { %907 = vmatmul.f32.vlgmr.msra.gmra.mxu1 %v2492_v44  ;;  %975 = vmatpush.msrb.mxu0 %v951_v54  ;;  %v1209_v54 = vld [vmem:[%s2726_s12 + $0xa8] sm:$0xff]  ;;  %s1625_s14 = scalar_lea.hbm %s2792_s19, %s1783_s1  ;;  %s2061_s1 = scalar_lea.hbm %s2792_s19, 64 }
  0x5f   : > { %1345 = vmatpush.msrb.mxu1 %v1340_v26  ;;  %1253 = vmatpush.msra.mxu2 %v1211_v51  ;;  %v1424_v26 = vld [vmem:[#allocation7 + $0x70] sm:$0xff]  ;;  %s1628_s7 = sshll.u32 %s1625_s14, 4  ;;  %s1629_s7 = int_to_ptr.hbm [resolvable:$true] %s1628_s7 }
  0x60   : > { %976 = vmatpush.msrb.mxu0 %v950_v55 }
  0x61   : > { %1245 = vmatmul.f32.gmra.mxu3 %v2511_v50  ;;  %1346 = vmatpush.msrb.mxu1 %v1339_v27  ;;  %v1423_v27 = vld [vmem:[#allocation7 + $0x68] sm:$0xff] }
  0x62   : > { %977 = vmatpush.msrb.mxu0 %v949_v56  ;;  %v1207_v56 = vld [vmem:[%s2726_s12 + $0x98] sm:$0xff]  ;;  %1254 = vmatpush.msra.mxu2 %v1209_v54 }
  0x63   : > { %1347 = vmatpush.msrb.mxu1 %v1338_v28  ;;  %v1422_v28 = vld [vmem:[#allocation7 + $0x60] sm:$0xff] }
  0x64   : > { %978 = vmatpush.msrb.mxu0 %v948_v57  ;;  %1255 = vmatpush.msra.mxu2 %v1207_v56  ;;  %v1205_v57 = vld [vmem:[%s2726_s12 + $0x88] sm:$0xff]  ;;  %v1410_v56 = vld [vmem:[#allocation7] sm:$0xff] }
  0x65   : > { %867 = vmatmul.f32.gmra.mxu0 %v2511_v50  ;;  %1348 = vmatpush.msrb.mxu1 %v1337_v29  ;;  %v1420_v29 = vld [vmem:[#allocation7 + $0x50] sm:$0xff] }
  0x66   : > { %910 = vmatmul.f32.gmra.mxu1 %v2511_v50  ;;  %1292 = vmatpush.msra.mxu0 %v1287_v58  ;;  %v1203_v58 = vld [vmem:[%s2726_s12 + $0x78] sm:$0xff] }
  0x67   : > { %1349 = vmatpush.msrb.mxu1 %v1336_v30  ;;  %1256 = vmatpush.msra.mxu2 %v1205_v57  ;;  %v1419_v30 = vld [vmem:[#allocation7 + $0x48] sm:$0xff] }
  0x68   : > { %1293 = vmatpush.msra.mxu0 %v1286_v59 }
  0x69   : > { %1350 = vmatpush.msrb.mxu1 %v1335_v31  ;;  %1257 = vmatpush.msra.mxu2 %v1203_v58  ;;  %v1418_v31 = vld [vmem:[#allocation7 + $0x40] sm:$0xff] }
  0x6a   : > { %1294 = vmatpush.msra.mxu0 %v1285_v60 }
  0x6b   : > { %1351 = vmatpush.msrb.mxu1 %v1334_v32  ;;  %v1417_v32 = vld [vmem:[#allocation7 + $0x38] sm:$0xff] }
  0x6c   : > { %1295 = vmatpush.msra.mxu0 %v1284_v61  ;;  %v1201_v61 = vld [vmem:[%s2726_s12 + $0x68] sm:$0xff] }
  0x6d   : > { %1352 = vmatpush.msrb.mxu1 %v1333_v34  ;;  %1258 = vmatpush.msra.mxu2 %v1201_v61 }
  0x6e   : > { %1296 = vmatpush.msra.mxu0 %v1283_v62 }
  0x6f   : > { %1353 = vmatpush.msrb.mxu1 %v1332_v35 }
  0x70   : > { %1297 = vmatpush.msra.mxu0 %v1282_v63 }
  0x71   : > { %1354 = vmatpush.msrb.mxu1 %v1331_v36  ;;  %v1416_v36 = vld [vmem:[#allocation7 + $0x30] sm:$0xff] }
  0x72   : > { %1298 = vmatpush.msra.mxu0 %v1281_v0  ;;  %v1199_v0 = vld [vmem:[%s2726_s12 + $0x58] sm:$0xff] }
  0x73   : > { %1355 = vmatpush.msrb.mxu1 %v1330_v37  ;;  %1259 = vmatpush.msra.mxu2 %v1199_v0  ;;  %v1415_v37 = vld [vmem:[#allocation7 + $0x28] sm:$0xff] }
  0x74   : > { %1299 = vmatpush.msra.mxu0 %v1280_v1 }
  0x75   : > { %1356 = vmatpush.msrb.mxu1 %v1329_v38 }
  0x76   : > { %1300 = vmatpush.msra.mxu0 %v1279_v2  ;;  %v1872_v2 = vld [vmem:[%s2729_s15] ss:$0 sm:$0xff] }
  0x77   : > { %1357 = vmatpush.msrb.mxu1 %v1328_v40  ;;  %v1414_v40 = vld [vmem:[#allocation7 + $0x20] sm:$0xff] }
  0x78   : > { %1301 = vmatpush.msra.mxu0 %v1278_v3  ;;  %v1197_v3 = vld [vmem:[%s2726_s12 + $0x48] sm:$0xff] }
  0x79   : > { %1358 = vmatpush.msrb.mxu1 %v1327_v42  ;;  %1260 = vmatpush.msra.mxu2 %v1197_v3  ;;  %v1413_v42 = vld [vmem:[#allocation7 + $0x18] sm:$0xff] }
  0x7a   : > { %1302 = vmatpush.msra.mxu0 %v1277_v4 }
  0x7b   : > { %1359 = vmatpush.msrb.mxu1 %v1326_v45 }
  0x7c   : > { %1303 = vmatpush.msra.mxu0 %v1276_v5  ;;  %v1195_v5 = vld [vmem:[%s2726_s12 + $0x38] sm:$0xff] }
  0x7d   : > { %1360 = vmatpush.msrb.mxu1 %v1325_v48  ;;  %1261 = vmatpush.msra.mxu2 %v1195_v5 }
  0x7e   : > { %1304 = vmatpush.msra.mxu0 %v1275_v6 }
  0x80   : > { %1305 = vmatpush.msra.mxu0 %v1274_v7 }
  0x82   : > { %1306 = vmatpush.msra.mxu0 %v1273_v8  ;;  %v1193_v8 = vld [vmem:[%s2726_s12 + $0x28] sm:$0xff] }
  0x83   : > { %1262 = vmatpush.msra.mxu2 %v1193_v8 }
  0x84   : > { %1307 = vmatpush.msra.mxu0 %v1272_v9 }
  0x85   : > { %1263 = vmatpush.msra.mxu2 %v1191_v11 }
  0xc7   : > { %v940_v12 = vpop.f32.mrf.mxu2 }
  0xcf   : > { %v943_v17 = vpop.f32.mrf.mxu2 }
  0xda   : > { %v2551_v33 = vpop.f32.mrf.mxu0 }
  0xdb   : > { %v908_v13 = vpop.f32.mrf.mxu1 }
  0xdc   : > { %v909_v14 = vadd.f32 %v1870_v10, %v908_v13  ;;  %v1243_v21 = vpop.f32.mrf.mxu3  ;;  %v1189_v13 = vld [vmem:[%s2726_s12 + $0x8] sm:$0xff] }
  0xdd   : > { %v1244_v23 = vadd.f32 %v1243_v21, %v1222_v22  ;;  %1264 = vmatpush.msra.mxu2 %v1189_v13 }
  0xde   : > { %v946_v15 = vadd.f32 %v940_v12, %v909_v14 }
  0xe0   : > { %1763 = vmatmul.msk.f32.vlgmr.msrb.gmra.mxu0 %vm956_vm2, %v946_v15 }
  0xe2   : > { %v2553_v39 = vpop.f32.mrf.mxu0 }
  0xe3   : > { %v911_v16 = vpop.f32.mrf.mxu1 }
  0xe4   : > { %v912_v18 = vadd.f32 %v1870_v10, %v911_v16  ;;  %v1246_v24 = vpop.f32.mrf.mxu3 }
  0xe5   : > { %v1247_v25 = vadd.f32 %v1246_v24, %v1222_v22 }
  0xe6   : > { %v947_v20 = vadd.f32 %v943_v17, %v912_v18 }
  0xe8   : > { %1764 = vmatmul.msk.f32.gmra.mxu0 %vm956_vm2, %v947_v20 }
  0xf0   : > { %1308 = vmatmul.f32.vlgmr.msra.gmra.mxu0 %v1244_v23 }
  0xf8   : > { %1311 = vmatmul.f32.gmra.mxu0 %v1247_v25  ;;  %v1425_v25 = vld [vmem:[#allocation7 + $0x78] sm:$0xff] }
  0xf9   : > { %1426 = vmatpush.msrb.mxu3 %v1425_v25 }
  0xfb   : > { %1427 = vmatpush.msrb.mxu3 %v1424_v26 }
  0xfd   : > { %1428 = vmatpush.msrb.mxu3 %v1423_v27 }
  0xff   : > { %1429 = vmatpush.msrb.mxu3 %v1422_v28 }
 0x15d   : > { %v980_v52 = vpop.f32.mrf.mxu0 }
 0x15e   : > { %v981_v53 = vadd.f32 %v1871_v46, %v980_v52  ;;  %v1411_v52 = vld [vmem:[#allocation7 + $0x8] sm:$0xff] }
 0x160   : > { %v988_v55 = vmul.f32 1.442695, %v981_v53  ;;  %vm986_vm4 = vcmp.gt.f32.partialorder %v981_v53, 0.0 }
 0x162   : > { %1879 = vpow2.f32 %v988_v55 }
 0x165   : > { %v983_v59 = vpop.f32.mrf.mxu0 }
 0x166   : > { %v984_v60 = vadd.f32 %v1871_v46, %v983_v59 }
 0x168   : > { %v1880_v62 = vpop.eup %1879  ;;  %v990_v63 = vmul.f32 1.442695, %v984_v60  ;;  %vm987_vm5 = vcmp.gt.f32.partialorder %v984_v60, 0.0 }
 0x169   : > { %v1765_v1 = vadd.f32 -1.0, %v1880_v62 }
 0x16a   : > { %1881 = vpow2.f32 %v990_v63 }
 0x16b   : > { %v2597_v4 = vsel %vm986_vm4, %v981_v53, %v1765_v1 }
 0x16c   : > { %1768 = vmatmul.msk.f32.vlgmr.msrb.gmra.mxu2 %vm1001_vm3, %v2597_v4 }
 0x16d   : > { %v1309_v6 = vpop.f32.mrf.mxu0  ;;  %1453 = vmatpush.msrb.mxu2 %v1425_v25 }
 0x16e   : > { %v1310_v7 = vadd.f32 %v1872_v2, %v1309_v6 }
 0x16f   : > { %1454 = vmatpush.msrb.mxu2 %v1424_v26 }
 0x170   : > { %v1882_v9 = vpop.eup %1881  ;;  %v1317_v10 = vmul.f32 1.442695, %v1310_v7  ;;  %vm1315_vm6 = vcmp.gt.f32.partialorder %v1310_v7, 0.0 }
 0x171   : > { %v1766_v12 = vadd.f32 -1.0, %v1882_v9  ;;  %1455 = vmatpush.msrb.mxu2 %v1423_v27 }
 0x172   : > { %1883 = vpow2.f32 %v1317_v10 }
 0x173   : > { %v2613_v14 = vsel %vm987_vm5, %v984_v60, %v1766_v12  ;;  %1456 = vmatpush.msrb.mxu2 %v1422_v28 }
 0x174   : > { %1769 = vmatmul.msk.f32.gmra.mxu2 %vm1001_vm3, %v2613_v14 }
 0x175   : > { %v1312_v15 = vpop.f32.mrf.mxu0 }
 0x176   : > { %v1313_v16 = vadd.f32 %v1872_v2, %v1312_v15 }
 0x178   : > { %v1884_v17 = vpop.eup %1883  ;;  %v1319_v18 = vmul.f32 1.442695, %v1313_v16  ;;  %vm1316_vm7 = vcmp.gt.f32.partialorder %v1313_v16, 0.0 }
 0x179   : > { %v1770_v20 = vadd.f32 -1.0, %v1884_v17 }
 0x17a   : > { %1885 = vpow2.f32 %v1319_v18 }
 0x17b   : > { %v2617_v21 = vsel %vm1315_vm6, %v1310_v7, %v1770_v20 }
 0x17c   : > { %1361 = vmatmul.f32.vlgmr.msrb.gmra.mxu1 %v2617_v21  ;;  %1265 = vmatmul.f32.vlgmr.msra.gmra.mxu2 %v2492_v44  ;;  %v1421_v44 = vld [vmem:[#allocation7 + $0x58] sm:$0xff] }
 0x17d   : > { %1430 = vmatpush.msrb.mxu3 %v1421_v44  ;;  %1457 = vmatpush.msrb.mxu2 %v1421_v44 }
 0x17f   : > { %1431 = vmatpush.msrb.mxu3 %v1420_v29  ;;  %1458 = vmatpush.msrb.mxu2 %v1420_v29 }
 0x180   : > { %v1886_v22 = vpop.eup %1885 }
 0x181   : > { %v1771_v23 = vadd.f32 -1.0, %v1886_v22  ;;  %1432 = vmatpush.msrb.mxu3 %v1419_v30  ;;  %1459 = vmatpush.msrb.mxu2 %v1419_v30 }
 0x183   : > { %v2621_v24 = vsel %vm1316_vm7, %v1313_v16, %v1771_v23  ;;  %1433 = vmatpush.msrb.mxu3 %v1418_v31  ;;  %1460 = vmatpush.msrb.mxu2 %v1418_v31 }
 0x184   : > { %1364 = vmatmul.f32.gmra.mxu1 %v2621_v24  ;;  %1268 = vmatmul.f32.gmra.mxu2 %v2511_v50  ;;  %v1873_v50 = vld [vmem:[%s2789_s4] ss:$0 sm:$0xff]  ;;  %s2055_s4 = sshra.s32 %s1629_s7, 4  ;;  %s2056_s4 = int_to_ptr.hbm [resolvable:$true] %s2055_s4 }
 0x185   : > { %1434 = vmatpush.msrb.mxu3 %v1417_v32  ;;  %1461 = vmatpush.msrb.mxu2 %v1417_v32  ;;  %s2057_s6 = scalar_lea.hbm %s2056_s4, 16  ;;  %p2062_p3 = scmp.lt.s32.totalorder %s2056_s4, %s2792_s19 }
 0x186   : > { %p2058_p0 = scmp.ne.s32.totalorder %s2056_s4, %s2057_s6  ;;  %p2063_p4 = scmp.lt.s32.totalorder %s2061_s1, %s2057_s6 }
 0x187   : > { %1435 = vmatpush.msrb.mxu3 %v1416_v36  ;;  %1462 = vmatpush.msrb.mxu2 %v1416_v36 }
 0x188   : > { %p2059_p1 = pnand %p2058_p0, %p2289_p5  ;;  %p2064_p7 = por %p2063_p4, %p2062_p3 }
 0x189   : > { %1436 = vmatpush.msrb.mxu3 %v1415_v37  ;;  %1463 = vmatpush.msrb.mxu2 %v1415_v37 }
 0x18a   : > { %p2060_p2 = pneg %p2059_p1 }
 0x18b   : > { %1437 = vmatpush.msrb.mxu3 %v1414_v40  ;;  %1464 = vmatpush.msrb.mxu2 %v1414_v40 }
 0x18c   : > { %p2065_p8 = pnand %p2064_p7, %p2060_p2 }
 0x18d   : > { %1438 = vmatpush.msrb.mxu3 %v1413_v42  ;;  %1465 = vmatpush.msrb.mxu2 %v1413_v42 }
 0x18f   : > { %1439 = vmatpush.msrb.mxu3 %v1412_v47  ;;  %1466 = vmatpush.msrb.mxu2 %v1412_v47 }
 0x191   : > { %1440 = vmatpush.msrb.mxu3 %v1411_v52  ;;  %1467 = vmatpush.msrb.mxu2 %v1411_v52 }
 0x193   : > { %1441 = vmatpush.msrb.mxu3 %v1410_v56  ;;  %1468 = vmatpush.msrb.mxu2 %v1410_v56 }
 0x1ef   : > { %v1029_v34 = vpop.f32.mrf.mxu2 }
 0x1f0   : > { %v1030_v35 = vadd.f32 %v1873_v50, %v1029_v34  ;;  %v1223_v34 = vperm.slane %v2548_v19, 1 }
 0x1f2   : > { %v1035_v38 = vsub.f32 0.0, %v1030_v35 }
 0x1f4   : > { %v1037_v41 = vmul.f32 1.442695, %v1035_v38 }
 0x1f6   : > { %1887 = vpow2.f32 %v1037_v41 }
 0x1f7   : > { %v1032_v45 = vpop.f32.mrf.mxu2 }
 0x1f8   : > { %v1033_v46 = vadd.f32 %v1873_v50, %v1032_v45 }
 0x1f9   : > { %v1362_v48 = vpop.f32.mrf.mxu1 }
 0x1fa   : > { %v1036_v49 = vsub.f32 0.0, %v1033_v46  ;;  %v1363_v51 = vadd.f32 %v1874_v43, %v1362_v48 }
 0x1fc   : > { %v1888_v53 = vpop.eup %1887  ;;  %v1039_v54 = vmul.f32 1.442695, %v1036_v49  ;;  %v1368_v55 = vsub.f32 0.0, %v1363_v51 }
 0x1fd   : > { %v1041_v57 = vadd.f32 1.0, %v1888_v53 }
 0x1fe   : > { %1889 = vpow2.f32 %v1039_v54  ;;  %v1370_v58 = vmul.f32 1.442695, %v1368_v55 }
 0x1ff   : > { %1891 = vrcp.f32 %v1041_v57  ;;  %v1054_v7 = vand.u32 2147483648, %v1041_v57  ;;  %v1052_v9 = vand.u32 2147483647, %v1041_v57  ;;  %vm1048_vm9 = vweird.f32 %v1041_v57  ;;  %v1266_v31 = vpop.f32.mrf.mxu2 }
 0x200   : > { %1893 = vpow2.f32 %v1370_v58  ;;  %v1267_v42 = vadd.f32 %v1266_v31, %v1223_v34 }
 0x201   : > { %v1365_v59 = vpop.f32.mrf.mxu1  ;;  %v1055_v12 = vor.u32 1.1754944e-38, %v1054_v7  ;;  %vm1053_vm11 = vcmp.eq.f32.partialorder %v1052_v9, 8.507059e+37 }
 0x202   : > { %v1366_v60 = vadd.f32 %v1874_v43, %v1365_v59 }
 0x204   : > { %v1890_v61 = vpop.eup %1889  ;;  %v1369_v62 = vsub.f32 0.0, %v1366_v60 }
 0x205   : > { %v1892_v63 = vpop.eup %1891  ;;  %v1042_v0 = vadd.f32 1.0, %v1890_v61 }
 0x206   : > { %v1894_v1 = vpop.eup %1893  ;;  %v1372_v2 = vmul.f32 1.442695, %v1369_v62  ;;  %v1044_v3 = vmul.f32 %v1892_v63, %v1041_v57  ;;  %vm1049_vm8 = vweird.f32 %v1892_v63 }
 0x207   : > { %1895 = vrcp.f32 %v1042_v0  ;;  %v1374_v5 = vadd.f32 1.0, %v1894_v1  ;;  %vm1050_vm10 = vmor %vm1048_vm9, %vm1049_vm8  ;;  %v1067_v22 = vand.u32 2147483647, %v1042_v0  ;;  %v1069_v23 = vand.u32 2147483648, %v1042_v0  ;;  %v1269_v56 = vpop.f32.mrf.mxu2 }
 0x208   : > { %1897 = vpow2.f32 %v1372_v2  ;;  %v1045_v6 = vsub.f32 1.0, %v1044_v3  ;;  %vm1063_vm15 = vweird.f32 %v1042_v0  ;;  %v1270_v58 = vadd.f32 %v1269_v56, %v1223_v34 }
 0x209   : > { %1899 = vrcp.f32 %v1374_v5  ;;  %vm1381_vm12 = vweird.f32 %v1374_v5  ;;  %v1385_v28 = vand.u32 2147483647, %v1374_v5  ;;  %v1387_v44 = vand.u32 2147483648, %v1374_v5 }
 0x20a   : > { %v1046_v8 = vmul.f32 %v1892_v63, %v1045_v6  ;;  %v1070_v37 = vor.u32 1.1754944e-38, %v1069_v23  ;;  %vm1068_vm5 = vcmp.eq.f32.partialorder %v1067_v22, 8.507059e+37 }
 0x20b   : > { %vm1386_vm4 = vcmp.eq.f32.partialorder %v1385_v28, 8.507059e+37 }
 0x20c   : > { %v1047_v10 = vadd.f32 %v1892_v63, %v1046_v8 }
 0x20d   : > { %v1896_v11 = vpop.eup %1895 }
 0x20e   : > { %v1898_v13 = vpop.eup %1897  ;;  %v1059_v15 = vmul.f32 %v1896_v11, %v1042_v0  ;;  %v1051_v16 = vsel %vm1050_vm10, %v1892_v63, %v1047_v10  ;;  %vm1064_vm13 = vweird.f32 %v1896_v11 }
 0x20f   : > { %v1900_v17 = vpop.eup %1899  ;;  %v1375_v18 = vadd.f32 1.0, %v1898_v13  ;;  %v1056_v20 = vsel %vm1053_vm11, %v1055_v12, %v1051_v16  ;;  %vm1065_vm0 = vmor %vm1063_vm15, %vm1064_vm13 }
 0x210   : > { %v1377_v25 = vmul.f32 %v1900_v17, %v1374_v5  ;;  %v1073_v26 = vmul.f32 %v1056_v20, %v2597_v4  ;;  %v1060_v27 = vsub.f32 1.0, %v1059_v15  ;;  %vm1382_vm14 = vweird.f32 %v1900_v17 }
 0x211   : > { %1901 = vrcp.f32 %v1375_v18  ;;  %vm1383_vm2 = vmor %vm1381_vm12, %vm1382_vm14  ;;  %v1388_v4 = vor.u32 1.1754944e-38, %v1387_v44  ;;  %vm1396_vm6 = vweird.f32 %v1375_v18  ;;  %v1400_v47 = vand.u32 2147483647, %v1375_v18 }
 0x212   : > { %v1075_v29 = vadd.f32 %v1073_v26, %v2551_v33  ;;  %v1378_v30 = vsub.f32 1.0, %v1377_v25  ;;  %v1061_v50 = vmul.f32 %v1896_v11, %v1060_v27  ;;  %v1402_v48 = vand.u32 2147483648, %v1375_v18 }
 0x213   : > { %vm1401_vm9 = vcmp.eq.f32.partialorder %v1400_v47, 8.507059e+37 }
 0x214   : > { %v1077_v32 = vsel %vm1001_vm3, %v1075_v29, 0.0  ;;  %v1379_v35 = vmul.f32 %v1900_v17, %v1378_v30  ;;  %v1062_v36 = vadd.f32 %v1896_v11, %v1061_v50  ;;  %v1403_v57 = vor.u32 1.1754944e-38, %v1402_v48 }
 0x215   : > { %1078 = vadd.xlane.f32.xlu0 %v1077_v32 }
 0x216   : > { %v1380_v38 = vadd.f32 %v1900_v17, %v1379_v35  ;;  %v1066_v33 = vsel %vm1065_vm0, %v1896_v11, %v1062_v36 }
 0x217   : > { %v1902_v40 = vpop.eup %1901  ;;  %v1071_v41 = vsel %vm1068_vm5, %v1070_v37, %v1066_v33 }
 0x218   : > { %v1384_v43 = vsel %vm1383_vm2, %v1900_v17, %v1380_v38  ;;  %v1074_v45 = vmul.f32 %v1071_v41, %v2613_v14  ;;  %v1392_v46 = vmul.f32 %v1902_v40, %v1375_v18  ;;  %vm1397_vm7 = vweird.f32 %v1902_v40 }
 0x219   : > { %v1389_v19 = vsel %vm1386_vm4, %v1388_v4, %v1384_v43  ;;  %vm1398_vm8 = vmor %vm1396_vm6, %vm1397_vm7  ;;  %v1875_v4 = vld [vmem:[%s2724_s10] ss:$0 sm:$0xff] }
 0x21a   : > { %v1406_v49 = vmul.f32 %v1389_v19, %v2617_v21  ;;  %v1076_v51 = vadd.f32 %v1074_v45, %v2553_v39  ;;  %v1393_v52 = vsub.f32 1.0, %v1392_v46  ;;  %v2123_v39 = vmov 4.0  }
 0x21b   : > { %1903 = vrcp.f32 %v2123_v39  ;;  %v1561_v39 = vld [vmem:[%s2737_s23] sm:$0xf] }
 0x21c   : > { %v1408_v53 = vadd.f32 %v1406_v49, %v1267_v42  ;;  %v1080_v54 = vsel %vm1001_vm3, %v1076_v51, 0.0  ;;  %v1394_v55 = vmul.f32 %v1902_v40, %v1393_v52 }
 0x21d   : > { %1081 = vadd.xlane.f32.xlu0 %v1080_v54 }
 0x21e   : > { %1442 = vmatmul.f32.vlgmr.msrb.gmra.mxu3 %v1408_v53  ;;  %v1395_v14 = vadd.f32 %v1902_v40, %v1394_v55 }
 0x220   : > { %v1399_v59 = vsel %vm1398_vm8, %v1902_v40, %v1395_v14  ;;  %v1876_v40 = vld [vmem:[%s2725_s11] ss:$0 sm:$0xff] }
 0x221   : > { %v1404_v60 = vsel %vm1401_vm9, %v1403_v57, %v1399_v59  ;;  %v1904_v62 = vpop.eup %1903 }
 0x222   : > { %v1407_v21 = vmul.f32 %v1404_v60, %v2621_v24  ;;  %v1084_v63 = vmul.f32 4.0, %v1904_v62  ;;  %vm1088_vm10 = vweird.f32 %v1904_v62 }
 0x224   : > { %v1409_v61 = vadd.f32 %v1407_v21, %v1270_v58  ;;  %v1085_v0 = vsub.f32 1.0, %v1084_v63 }
 0x226   : > { %1445 = vmatmul.f32.gmra.mxu3 %v1409_v61  ;;  %v1086_v1 = vmul.f32 %v1904_v62, %v1085_v0 }
 0x228   : > { %v1087_v2 = vadd.f32 %v1904_v62, %v1086_v1 }
 0x22a   : > { %v1089_v3 = vsel %vm1088_vm10, %v1904_v62, %v1087_v2 }
 0x288   : > { %v1079_v5 = vpop.xlane.xlu0 %1078 }
 0x289   : > { %v1090_v6 = vmul.f32 %v1089_v3, %v1079_v5 }
 0x28b   : > { %v1092_v7 = vsub.f32 %v1075_v29, %v1090_v6 }
 0x28d   : > { %v1094_v8 = vmul.f32 %v1092_v7, %v1092_v7 }
 0x28f   : > { %v1096_v9 = vsel %vm1001_vm3, %v1094_v8, 0.0  ;;  %v1559_v8 = vld [vmem:[#allocation8 + $0x70] sm:$0xff] }
 0x290   : > { %1097 = vadd.xlane.f32.xlu1 %v1096_v9  ;;  %v1082_v10 = vpop.xlane.xlu0 %1081 }
 0x291   : > { %v1091_v24 = vmul.f32 %v1089_v3, %v1082_v10  ;;  %v1558_v10 = vld [vmem:[#allocation8 + $0x68] sm:$0xff] }
 0x293   : > { %v1093_v11 = vsub.f32 %v1076_v51, %v1091_v24 }
 0x295   : > { %v1095_v12 = vmul.f32 %v1093_v11, %v1093_v11 }
 0x297   : > { %v1099_v13 = vsel %vm1001_vm3, %v1095_v12, 0.0 }
 0x298   : > { %1100 = vadd.xlane.f32.xlu1 %v1099_v13 }
 0x2a1   : > { %v1443_v15 = vpop.f32.mrf.mxu3 }
 0x2a2   : > { %v2643_v16 = vsub.f32 %v1408_v53, %v1443_v15  ;;  %v1557_v15 = vld [vmem:[#allocation8 + $0x60] sm:$0xff] }
 0x2a4   : > { %v1451_v17 = vmul.f32 %v2643_v16, %v2643_v16 }
 0x2a6   : > { %1469 = vmatmul.f32.vlgmr.msrb.gmra.mxu2 %v1451_v17 }
 0x2a9   : > { %v1446_v18 = vpop.f32.mrf.mxu3 }
 0x2aa   : > { %v2647_v20 = vsub.f32 %v1409_v61, %v1446_v18  ;;  %v1510_v61 = vld [vmem:[%s2735_s21] sm:$0xf] }
 0x2ab   : > { %1772 = vmatpush.msk.msrb.mxu0 %vm1008_vm1, %v1510_v61  ;;  %1784 = vmatpush.msk.msra.mxu1 %vm1008_vm1, %v1510_v61  ;;  %v1878_v61 = vld [vmem:[%s2790_s27] ss:$0 sm:$0xff] }
 0x2ac   : > { %v1452_v22 = vmul.f32 %v2647_v20, %v2647_v20 }
 0x2ad   : > { %1775 = vmatpush.msk.msrb.mxu1 %vm1008_vm1, %v1561_v39 }
 0x2ae   : > { %1472 = vmatmul.f32.gmra.mxu2 %v1452_v22 }
 0x303   : > { %v1098_v23 = vpop.xlane.xlu1 %1097 }
 0x304   : > { %v1102_v25 = vmul.f32 %v1098_v23, %v1089_v3  ;;  %v1556_v23 = vld [vmem:[#allocation8 + $0x58] sm:$0xff] }
 0x306   : > { %v1104_v26 = vadd.f32 1e-05, %v1102_v25 }
 0x308   : > { %1905 = vrsqrt.f32 %v1104_v26  ;;  %vm1112_vm12 = vweird.f32 %v1104_v26 }
 0x30b   : > { %v1101_v27 = vpop.xlane.xlu1 %1100 }
 0x30c   : > { %v1103_v28 = vmul.f32 %v1101_v27, %v1089_v3 }
 0x30e   : > { %v1906_v44 = vpop.eup %1905  ;;  %v1105_v29 = vadd.f32 1e-05, %v1103_v28  ;;  %v1555_v28 = vld [vmem:[#allocation8 + $0x50] sm:$0xff] }
 0x30f   : > { %v1107_v30 = vmul.f32 %v1906_v44, %v1104_v26  ;;  %vm1113_vm11 = vweird.f32 %v1906_v44 }
 0x310   : > { %1907 = vrsqrt.f32 %v1105_v29  ;;  %vm1114_vm13 = vmor %vm1112_vm12, %vm1113_vm11  ;;  %vm1122_vm15 = vweird.f32 %v1105_v29 }
 0x311   : > { %v1108_v50 = vmul.f32 %v1906_v44, %v1107_v30 }
 0x313   : > { %v1109_v31 = vmul.f32 0.5, %v1108_v50 }
 0x315   : > { %v1110_v32 = vsub.f32 1.5, %v1109_v31  ;;  %v1553_v31 = vld [vmem:[#allocation8 + $0x40] sm:$0xff] }
 0x316   : > { %v1908_v34 = vpop.eup %1907 }
 0x317   : > { %v1111_v35 = vmul.f32 %v1906_v44, %v1110_v32  ;;  %v1117_v36 = vmul.f32 %v1908_v34, %v1105_v29  ;;  %vm1123_vm14 = vweird.f32 %v1908_v34  ;;  %v1554_v29 = vld [vmem:[#allocation8 + $0x48] sm:$0xff] }
 0x318   : > { %vm1124_vm0 = vmor %vm1122_vm15, %vm1123_vm14 }
 0x319   : > { %v1118_v37 = vmul.f32 %v1908_v34, %v1117_v36  ;;  %v1115_v38 = vsel %vm1114_vm13, %v1906_v44, %v1111_v35  ;;  %v1552_v35 = vld [vmem:[#allocation8 + $0x38] sm:$0xff]  ;;  %v1551_v36 = vld [vmem:[#allocation8 + $0x30] sm:$0xff] }
 0x31a   : > { %v1126_v33 = vmul.f32 %v1115_v38, %v1092_v7  ;;  %v1560_v7 = vld [vmem:[#allocation8 + $0x78] sm:$0xff] }
 0x31b   : > { %v1119_v41 = vmul.f32 0.5, %v1118_v37  ;;  %1588 = vmatpush.msra.mxu3 %v1560_v7  ;;  %v1549_v37 = vld [vmem:[#allocation8 + $0x20] sm:$0xff]  ;;  %v1548_v38 = vld [vmem:[#allocation8 + $0x18] sm:$0xff] }
 0x31c   : > { %v1132_v42 = vmul.f32 %v1875_v4, %v1126_v33  ;;  %v1547_v33 = vld [vmem:[#allocation8 + $0x10] sm:$0xff] }
 0x31d   : > { %v1120_v43 = vsub.f32 1.5, %v1119_v41  ;;  %1589 = vmatpush.msra.mxu3 %v1559_v8 }
 0x31e   : > { %v1138_v45 = vadd.f32 %v1876_v40, %v1132_v42 }
 0x31f   : > { %v1121_v46 = vmul.f32 %v1908_v34, %v1120_v43  ;;  %1590 = vmatpush.msra.mxu3 %v1558_v10 }
 0x320   : > { %v1140_v19 = vsel %vm1001_vm3, %v1138_v45, -inf }
 0x321   : > { %1141 = vmax.xlane.f32.xlu2 %v1140_v19  ;;  %v1125_v47 = vsel %vm1124_vm0, %v1908_v34, %v1121_v46  ;;  %1591 = vmatpush.msra.mxu3 %v1557_v15  ;;  %v1546_v19 = vld [vmem:[#allocation8 + $0x8] sm:$0xff] }
 0x322   : > { %v1127_v48 = vmul.f32 %v1125_v47, %v1093_v11  ;;  %v1545_v47 = vld [vmem:[#allocation8] sm:$0xff] }
 0x323   : > { %1592 = vmatpush.msra.mxu3 %v1556_v23 }
 0x324   : > { %v1133_v49 = vmul.f32 %v1875_v4, %v1127_v48  ;;  %v1550_v4 = vld [vmem:[#allocation8 + $0x28] sm:$0xff] }
 0x325   : > { %1593 = vmatpush.msra.mxu3 %v1555_v28 }
 0x326   : > { %v1139_v51 = vadd.f32 %v1876_v40, %v1133_v49 }
 0x327   : > { %1594 = vmatpush.msra.mxu3 %v1554_v29 }
 0x328   : > { %v1143_v52 = vsel %vm1001_vm3, %v1139_v51, -inf }
 0x329   : > { %1144 = vmax.xlane.f32.xlu2 %v1143_v52  ;;  %1595 = vmatpush.msra.mxu3 %v1553_v31  ;;  %v1470_v40 = vpop.f32.mrf.mxu2 }
 0x32a   : > { %v1471_v41 = vadd.f32 1e-05, %v1470_v40 }
 0x32b   : > { %1596 = vmatpush.msra.mxu3 %v1552_v35 }
 0x32c   : > { %vm1482_vm10 = vweird.f32 %v1471_v41 }
 0x32d   : > { %1597 = vmatpush.msra.mxu3 %v1551_v36 }
 0x32f   : > { %1598 = vmatpush.msra.mxu3 %v1550_v4 }
 0x331   : > { %1599 = vmatpush.msra.mxu3 %v1549_v37  ;;  %v1473_v42 = vpop.f32.mrf.mxu2 }
 0x332   : > { %v1474_v43 = vadd.f32 1e-05, %v1473_v42 }
 0x333   : > { %1600 = vmatpush.msra.mxu3 %v1548_v38 }
 0x334   : > { %vm1492_vm12 = vweird.f32 %v1474_v43 }
 0x335   : > { %1601 = vmatpush.msra.mxu3 %v1547_v33 }
 0x337   : > { %1602 = vmatpush.msra.mxu3 %v1546_v19 }
 0x339   : > { %1603 = vmatpush.msra.mxu3 %v1545_v47 }
 0x394   : > { %v1142_v53 = vpop.xlane.xlu2 %1141 }
 0x395   : > { %v1146_v54 = vsub.f32 %v1138_v45, %v1142_v53 }
 0x397   : > { %v1148_v55 = vmul.f32 1.442695, %v1146_v54 }
 0x399   : > { %1909 = vpow2.f32 %v1148_v55 }
 0x39c   : > { %v1145_v56 = vpop.xlane.xlu2 %1144 }
 0x39d   : > { %v1147_v57 = vsub.f32 %v1139_v51, %v1145_v56 }
 0x39f   : > { %v1910_v14 = vpop.eup %1909  ;;  %v1150_v58 = vmul.f32 1.442695, %v1147_v57 }
 0x3a0   : > { %v1152_v59 = vsel %vm1001_vm3, %v1910_v14, 0.0 }
 0x3a1   : > { %1911 = vpow2.f32 %v1150_v58  ;;  %1153 = vadd.xlane.f32.xlu0 %v1152_v59  ;;  %v1877_v59 = vld [vmem:[%s2732_s18] ss:$0 sm:$0xff] }
 0x3a7   : > { %v1912_v60 = vpop.eup %1911 }
 0x3a8   : > { %v1155_v21 = vsel %vm1001_vm3, %v1912_v60, 0.0 }
 0x3a9   : > { %1156 = vadd.xlane.f32.xlu1 %v1155_v21 }
 0x414   : > { %v1154_v62 = vpop.xlane.xlu0 %1153 }
 0x415   : > { %1913 = vrcp.f32 %v1154_v62  ;;  %v1169_v3 = vand.u32 2147483648, %v1154_v62  ;;  %v1167_v6 = vand.u32 2147483647, %v1154_v62  ;;  %vm1163_vm4 = vweird.f32 %v1154_v62 }
 0x417   : > { %v1170_v11 = vor.u32 1.1754944e-38, %v1169_v3  ;;  %vm1168_vm1 = vcmp.eq.f32.partialorder %v1167_v6, 8.507059e+37 }
 0x41b   : > { %v1914_v63 = vpop.eup %1913 }
 0x41c   : > { %v1159_v0 = vmul.f32 %v1914_v63, %v1154_v62  ;;  %v1157_v1 = vpop.xlane.xlu1 %1156  ;;  %vm1164_vm2 = vweird.f32 %v1914_v63 }
 0x41d   : > { %1915 = vrcp.f32 %v1157_v1  ;;  %vm1165_vm5 = vmor %vm1163_vm4, %vm1164_vm2  ;;  %v1184_v25 = vand.u32 2147483648, %v1157_v1  ;;  %v1182_v27 = vand.u32 2147483647, %v1157_v1  ;;  %vm1178_vm7 = vweird.f32 %v1157_v1 }
 0x41e   : > { %v1160_v2 = vsub.f32 1.0, %v1159_v0  ;;  %1917 = vrsqrt.f32 %v1471_v41 }
 0x41f   : > { %v1185_v30 = vor.u32 1.1754944e-38, %v1184_v25  ;;  %vm1183_vm9 = vcmp.eq.f32.partialorder %v1182_v27, 8.507059e+37  ;;  %1919 = vrsqrt.f32 %v1474_v43 }
 0x420   : > { %v1161_v5 = vmul.f32 %v1914_v63, %v1160_v2 }
 0x422   : > { %v1162_v9 = vadd.f32 %v1914_v63, %v1161_v5 }
 0x423   : > { %v1916_v24 = vpop.eup %1915 }
 0x424   : > { %v1166_v12 = vsel %vm1165_vm5, %v1914_v63, %v1162_v9  ;;  %v1174_v13 = vmul.f32 %v1916_v24, %v1157_v1  ;;  %vm1179_vm6 = vweird.f32 %v1916_v24  ;;  %v1918_v45 = vpop.eup %1917 }
 0x425   : > { %v1171_v17 = vsel %vm1168_vm1, %v1170_v11, %v1166_v12  ;;  %vm1180_vm8 = vmor %vm1178_vm7, %vm1179_vm6  ;;  %v1477_v46 = vmul.f32 %v1918_v45, %v1471_v41  ;;  %v1920_v49 = vpop.eup %1919 }
 0x426   : > { %v1172_v18 = vmul.f32 %v1910_v14, %v1171_v17  ;;  %v1175_v22 = vsub.f32 1.0, %v1174_v13  ;;  %v1487_v52 = vmul.f32 %v1920_v49, %v1474_v43  ;;  %vm1493_vm13 = vweird.f32 %v1920_v49 }
 0x427   : > { %v1478_v48 = vmul.f32 %v1918_v45, %v1477_v46  ;;  %vm1494_vm14 = vmor %vm1492_vm12, %vm1493_vm13 }
 0x428   : > { %v1176_v26 = vmul.f32 %v1916_v24, %v1175_v22  ;;  %1773 = vmatmul.msk.f32.vlgmr.msrb.gmra.mxu0 %vm1001_vm3, %v1172_v18  ;;  %v1488_v54 = vmul.f32 %v1920_v49, %v1487_v52 }
 0x429   : > { %v1479_v51 = vmul.f32 0.5, %v1478_v48 }
 0x42a   : > { %v1177_v44 = vadd.f32 %v1916_v24, %v1176_v26  ;;  %v1489_v56 = vmul.f32 0.5, %v1488_v54 }
 0x42b   : > { %v1480_v53 = vsub.f32 1.5, %v1479_v51 }
 0x42c   : > { %v1181_v50 = vsel %vm1180_vm8, %v1916_v24, %v1177_v44  ;;  %v1490_v57 = vsub.f32 1.5, %v1489_v56 }
 0x42d   : > { %v1186_v32 = vsel %vm1183_vm9, %v1185_v30, %v1181_v50  ;;  %v1481_v55 = vmul.f32 %v1918_v45, %v1480_v53 }
 0x42e   : > { %v1187_v34 = vmul.f32 %v1912_v60, %v1186_v32  ;;  %v1491_v60 = vmul.f32 %v1920_v49, %v1490_v57 }
 0x430   : > { %1774 = vmatmul.msk.f32.vlgmr.msra.gmra.mxu1 %vm1001_vm3, %v1187_v34  ;;  %v1495_v39 = vsel %vm1494_vm14, %v1920_v49, %v1491_v60 }
 0x431   : > { %v1497_v63 = vmul.f32 %v1495_v39, %v2647_v20 }
 0x438   : > { %1776 = vmatmul.msk.f32.vlgmr.msrb.gmra.mxu1 %vm1001_vm3, %v1172_v18 }
 0x440   : > { %1777 = vmatmul.msk.f32.gmra.mxu1 %vm1001_vm3, %v1187_v34  ;;  %vm1483_vm3 = vweird.f32 %v1918_v45 }
 0x441   : > { %vm1484_vm11 = vmor %vm1482_vm10, %vm1483_vm3 }
 0x442   : > { %v1485_v14 = vsel %vm1484_vm11, %v1918_v45, %v1481_v55 }
 0x443   : > { %v1496_v58 = vmul.f32 %v1485_v14, %v2643_v16  ;;  %v1503_v16 = vmul.f32 %v1877_v59, %v1497_v63 }
 0x445   : > { %v1502_v21 = vmul.f32 %v1877_v59, %v1496_v58  ;;  %v1509_v2 = vadd.f32 %v1878_v61, %v1503_v16 }
 0x447   : > { %v1508_v62 = vadd.f32 %v1878_v61, %v1502_v21 }
 0x4a5   : > { %v1537_v0 = vpop.f32.mrf.mxu0 }
 0x4a6   : > { %v1543_v1 = vmul.f32 %v1537_v0, %v1508_v62 }
 0x4a8   : > { %1604 = vmatmul.f32.vlgmr.msra.gmra.mxu3 %v1543_v1 }
 0x4ad   : > { %v1540_v3 = vpop.f32.mrf.mxu1 }
 0x4ae   : > { %v1544_v5 = vmul.f32 %v1540_v3, %v1509_v2 }
 0x4b0   : > { %1607 = vmatmul.f32.gmra.mxu3 %v1544_v5 }
 0x4b5   : > { %v1582_v6 = vpop.f32.mrf.mxu1 }
 0x4bd   : > { %v1585_v20 = vpop.f32.mrf.mxu1 }
 0x52b   : > { %v1605_v7 = vpop.f32.mrf.mxu3 }
 0x52c   : > { %v1606_v8 = vadd.f32 %v1605_v7, %v1582_v6 }
 0x52e   : > { %1611 = vst [vmem:[%s814_s0] sm:$0xff] %v1606_v8 }
 0x533   : > { %v1608_v9 = vpop.f32.mrf.mxu3 }
 0x534   : > { %v1609_v10 = vadd.f32 %v1608_v9, %v1585_v20 }
 0x536   : > { %1612 = vst [vmem:[%s814_s0 + $0x8] sm:$0xff] %v1609_v10 }
 0x537   : > { %2068 = shalt.err (!%p2065_p8)
}
 0x538   : > { %s2124_s28 = smov 128   ;;  %s2125_s0 = smov 8  }
 0x539   : > { %1801 = dma.vmem_to_hbm [thread:$0]  (%p2289_p5), %s1627_s24, 256, %s1629_s7, %s1614_s5, %s2124_s28, %s2124_s28, %s2125_s0  }
 0x53a PF: > { %s2793_s14 = sld [smem:[#allocation17_spill]] }
 0x53b   : > { %s2794_s2 = sld [smem:[#allocation15_spill]] }
 0x540   : > { %p1828_p9 = scmp.ge.s32.totalorder %s2793_s14, 2 }
 0x541   : > { %s1643_s27 = sand.u32 1, %s2794_s2  }
 0x542   : > { %p1817_p10 = pnand %p1828_p9, %p2293_p6  ;;  %s1644_s8 = scalar_lea.sflag [#allocation4], %s1643_s27 }
 0x544   : > { %p1818_p11 = pneg %p1817_p10 }
 0x546   : > { %2098 = dma.done.wait (%p1818_p11), %s1644_s8, 256  }
 0x547   : > { %2100 = vsyncadd (%p1818_p11), %s1644_s8, 4294967040  ;;  %s2796_s28 = sld [smem:[#allocation18_spill]]  ;;  %s2799_s5 = smov %s2107_s26 }
 0x548   : > { %s2797_s4 = sld [smem:[#allocation16_spill]] }
 0x549   : > { %s2798_s27 = sld [smem:[#allocation19_spill]] }
 0x54d   : > { %p37_p12 = scmp.ge.s32.totalorder %s2796_s28, 6  }
 0x54e   : > { %s2800_s26 = smov %s2797_s4 }
 0x54f   :  { %39 = sbr.rel (!%p37_p12) target bundleno = 20 (0x14), region = 171 }
 0x554   :  { %1650 = vsyncpa [#allocation3], 1 }
 0x555   :  { %1652 = vsyncpa [#allocation3 + $0x1], 1 }
 0x556   :  { %1653 = vsyncpa [#allocation6], 1 }
 0x557   :  { %1654 = vsyncpa [#allocation9], 1 }
 0x558   :  { %1655 = vsyncpa [#allocation4], 1 }
 0x559   :  { %1657 = vsyncpa [#allocation4 + $0x1], 1 }

</bundles_post_ra>
